<compile_context>
chip_gen: v7x
topology: tpu7x:2x2x1
jax: 0.10.0
libtpu: 0.0.40
codegen_flags: <defaults>
</compile_context>

<pallas_src>
import functools
import math

import numpy as np

import jax
import jax.numpy as jnp
from jax import lax
from jax.experimental import pallas as pl
from jax.experimental.pallas import tpu as pltpu

CHANNELS = 32
HEADS = 4
HEAD_DIM = CHANNELS // HEADS
MXU_DTYPE = jnp.bfloat16      # MXU operand dtype (accumulation stays f32)

# Bias/BN slab row indices (each row starts at a sublane multiple of 8).
(ROW_B_EDGE, ROW_GIN_B1, ROW_GIN_B2, ROW_B_QKV, ROW_B_O, ROW_S12, ROW_SH12,
 ROW_MLP_B1, ROW_MLP_B2, ROW_S3, ROW_SH3, ROW_B_EMB) = range(12)
N_BIAS_ROWS = 12


# ----------------------------------------------------------------------------
# Kernel
# ----------------------------------------------------------------------------
def _mm(a_f32, w_bf16):
    """MXU matmul: activation cast to bf16 in-kernel, weights already bf16."""
    return jnp.dot(a_f32.astype(MXU_DTYPE), w_bf16,
                   preferred_element_type=jnp.float32)


def _brow(b_ref, idx, width):
    """(1, width) f32 view of bias-slab row `idx` (rows live at sublane 8*idx)."""
    r = idx * 8
    return b_ref[r:r + 1, 0:width]


def _gps_layer(x, adj, qmask, sel, w_ref, b_ref, *, one_plus_eps, relu_out):
    """One GPSConv(channels, GINEConv(...), heads=4) layer, eval mode.

    w_ref: (4C, 4C) bf16 packed weight slab
      [0:C,   0:3C ] w_qkv (q-part pre-scaled by 1/sqrt(Dh))   [0:C,  3C:4C] gin_w1
      [C:2C,  0:C  ] gin_w2*s1   [C:2C, C:2C] w_o*s2           [C:2C, 2C:4C] mlp_w1
      [2C:4C, 0:C  ] mlp_w2*s3
    b_ref: (8*N_BIAS_ROWS, 4C) f32 bias/BN slab (see ROW_* constants).
    """
    C = CHANNELS
    n = x.shape[0]
    xb = x.astype(MXU_DTYPE)

    w_qkv = w_ref[0:C, 0:3 * C]
    gin_w1 = w_ref[0:C, 3 * C:4 * C]
    gin_w2 = w_ref[C:2 * C, 0:C]
    w_o = w_ref[C:2 * C, C:2 * C]
    mlp_w1 = w_ref[C:2 * C, 2 * C:4 * C]
    mlp_w2 = w_ref[2 * C:4 * C, 0:C]

    # --- GINEConv branch ------------------------------------------------------
    # message = relu(x_src + lin(edge_attr)); edge_attr == 0 -> lin bias only.
    msg = jnp.maximum(x + _brow(b_ref, ROW_B_EDGE, C), 0.0)
    agg = jnp.dot(adj, msg.astype(MXU_DTYPE), preferred_element_type=jnp.float32)
    if one_plus_eps == 1.0:                       # trace-time constant
        g = agg + x
    else:
        g = agg + one_plus_eps * x
    g = jnp.maximum(_mm(g, gin_w1) + _brow(b_ref, ROW_GIN_B1, C), 0.0)
    g = _mm(g, gin_w2) + _brow(b_ref, ROW_GIN_B2, C)     # BN1 scale pre-folded

    # --- Multihead self-attention branch (single dense graph, no mask) -------
    qkv = jnp.dot(xb, w_qkv, preferred_element_type=jnp.float32) \
        + _brow(b_ref, ROW_B_QKV, 3 * C)                 # (n, 3C); 1/sqrt(Dh) folded
    q = qkv[:, 0:C]
    k = qkv[:, C:2 * C]
    v = qkv[:, 2 * C:3 * C]

    # Per-head scores stacked along sublanes as (H*n, n) so softmax is a plain
    # lane reduction; qmask[h*n+i, c] = 1 iff channel c belongs to head h.
    q_rep = jnp.concatenate([q] * HEADS, axis=0) * qmask           # (H*n, C)
    s = lax.dot_general(q_rep.astype(MXU_DTYPE), k.astype(MXU_DTYPE),
                        (((1,), (1,)), ((), ())),                  # contract last dims
                        preferred_element_type=jnp.float32)        # (H*n, n)
    s = s - jnp.max(s, axis=-1, keepdims=True)
    e = jnp.exp(s)
    prob = e * pl.reciprocal(jnp.sum(e, axis=-1, keepdims=True), approx=True)
    r = jnp.dot(prob.astype(MXU_DTYPE), v.astype(MXU_DTYPE),
                preferred_element_type=jnp.float32)                # (H*n, C)
    rm = (r * qmask).astype(MXU_DTYPE)          # keep only head h's channel block
    attn = jnp.dot(sel, rm, preferred_element_type=jnp.float32)    # (n, C): row h(c)*n+i
    attn = _mm(attn, w_o) + _brow(b_ref, ROW_B_O, C)               # BN2 scale pre-folded

    # --- residuals + BN1/BN2 (scales on linear outputs already folded) -------
    out = g + attn + x * _brow(b_ref, ROW_S12, C) + _brow(b_ref, ROW_SH12, C)

    # --- MLP + residual + BN3 -------------------------------------------------
    m = jnp.maximum(_mm(out, mlp_w1) + _brow(b_ref, ROW_MLP_B1, 2 * C), 0.0)
    m = _mm(m, mlp_w2) + _brow(b_ref, ROW_MLP_B2, C)               # BN3 scale pre-folded
    out = out * _brow(b_ref, ROW_S3, C) + m + _brow(b_ref, ROW_SH3, C)
    if relu_out:                 # the F.relu after conv1 in GraphTransformer.forward
        out = jnp.maximum(out, 0.0)
    return out


def _fused_forward_kernel(x_ref, adj_ref, w_emb_ref, qmask_ref, sel_ref,
                          w1_ref, b1_ref, w2_ref, b2_ref, o_ref,
                          *, one_plus_eps1, one_plus_eps2):
    adj = adj_ref[...]
    qmask = qmask_ref[...]
    sel = sel_ref[...]

    # self.emb  (x and w_emb pre-cast to bf16 host-side)
    x = jnp.dot(x_ref[...], w_emb_ref[...], preferred_element_type=jnp.float32)
    x = x + _brow(b1_ref, ROW_B_EMB, CHANNELS)

    # relu(conv1(...))
    x = _gps_layer(x, adj, qmask, sel, w1_ref, b1_ref,
                   one_plus_eps=one_plus_eps1, relu_out=True)
    # TODO(synk): F.dropout between the convs is stochastic in training; identity here (eval).
    # conv2
    x = _gps_layer(x, adj, qmask, sel, w2_ref, b2_ref,
                   one_plus_eps=one_plus_eps2, relu_out=False)
    o_ref[...] = x


# ----------------------------------------------------------------------------
# Host-side packing (done once, outside the per-call wrapper)
# ----------------------------------------------------------------------------
def make_masks(n):
    """qmask (H*n, C) f32: 1 iff channel c belongs to the head of score-row block.
    sel (n, H*n) bf16: selection matrix so that (sel @ (r*qmask))[i,c] = r[h(c)*n+i, c]."""
    col_head = np.arange(CHANNELS) // HEAD_DIM                       # (C,)
    row_head = np.repeat(np.arange(HEADS), n)                        # (H*n,)
    qmask = (row_head[:, None] == col_head[None, :]).astype(np.float32)
    node = np.arange(HEADS * n) % n                                  # (H*n,)
    sel = (np.arange(n)[:, None] == node[None, :]).astype(np.float32)
    return jnp.asarray(qmask), jnp.asarray(sel, dtype=MXU_DTYPE)


def pack_gps_params(p, b_emb=None):
    """Fold BN scales / attention scale into weights and pack into two slabs."""
    C = CHANNELS
    f = lambda a: np.asarray(a, dtype=np.float32)
    s1, sh1 = f(p["bn1_scale"]), f(p["bn1_shift"])
    s2, sh2 = f(p["bn2_scale"]), f(p["bn2_shift"])
    s3, sh3 = f(p["bn3_scale"]), f(p["bn3_shift"])
    inv_sqrt = 1.0 / math.sqrt(HEAD_DIM)

    w_slab = np.zeros((4 * C, 4 * C), np.float32)
    w_slab[0:C, 0:C] = f(p["w_q"]) * inv_sqrt          # attention scale folded (exact f32)
    w_slab[0:C, C:2 * C] = f(p["w_k"])
    w_slab[0:C, 2 * C:3 * C] = f(p["w_v"])
    w_slab[0:C, 3 * C:4 * C] = f(p["gin_w1"])
    w_slab[C:2 * C, 0:C] = f(p["gin_w2"]) * s1         # BN1 scale folded per out-column
    w_slab[C:2 * C, C:2 * C] = f(p["w_o"]) * s2        # BN2 scale folded
    w_slab[C:2 * C, 2 * C:4 * C] = f(p["mlp_w1"])
    w_slab[2 * C:4 * C, 0:C] = f(p["mlp_w2"]) * s3     # BN3 scale folded

    b_slab = np.zeros((N_BIAS_ROWS * 8, 4 * C), np.float32)

    def put(row, vec):
        v = np.asarray(vec, np.float32).reshape(-1)
        b_slab[row * 8, :v.shape[0]] = v

    put(ROW_B_EDGE, p["b_edge"])
    put(ROW_GIN_B1, p["gin_b1"])
    put(ROW_GIN_B2, f(p["gin_b2"]) * s1)
    put(ROW_B_QKV, np.concatenate([f(p["b_q"]).reshape(-1) * inv_sqrt,
                                   f(p["b_k"]).reshape(-1),
                                   f(p["b_v"]).reshape(-1)]))
    put(ROW_B_O, f(p["b_o"]) * s2)
    put(ROW_S12, s1 + s2)
    put(ROW_SH12, sh1 + sh2)
    put(ROW_MLP_B1, p["mlp_b1"])
    put(ROW_MLP_B2, f(p["mlp_b2"]) * s3)
    put(ROW_S3, s3)
    put(ROW_SH3, sh3)
    if b_emb is not None:
        put(ROW_B_EMB, b_emb)

    return jnp.asarray(w_slab, dtype=MXU_DTYPE), jnp.asarray(b_slab)


def pack_inputs(x, adj, w_emb, b_emb, params1, params2):
    """One-time host prep: bf16 cast of MXU operands, mask build, slab packing."""
    n = x.shape[0]
    qmask, sel = make_masks(n)
    w1, b1 = pack_gps_params(params1, b_emb=b_emb)
    w2, b2 = pack_gps_params(params2)
    return (jnp.asarray(x, dtype=MXU_DTYPE), jnp.asarray(adj, dtype=MXU_DTYPE),
            jnp.asarray(w_emb, dtype=MXU_DTYPE), qmask, sel, w1, b1, w2, b2)


def graph_transformer_forward(packed, *, eps1=0.0, eps2=0.0):
    """Fused emb + conv1 + relu + conv2 forward on a single graph (eval mode)."""
    n = packed[0].shape[0]
    vmem = pl.BlockSpec(memory_space=pltpu.MemorySpace.VMEM)
    kernel = functools.partial(_fused_forward_kernel,
                               one_plus_eps1=1.0 + float(eps1),
                               one_plus_eps2=1.0 + float(eps2))
    return pl.pallas_call(
        kernel,
        out_shape=jax.ShapeDtypeStruct((n, CHANNELS), jnp.float32),
        in_specs=[vmem] * len(packed),
        out_specs=vmem,
    )(*packed)


# ----------------------------------------------------------------------------
# Parameter construction (deterministic, synthetic)
# ----------------------------------------------------------------------------
def _init(key, shape, scale=0.1):
    return scale * jax.random.normal(key, shape, dtype=jnp.float32)


def init_gps_params(key):
    ks = jax.random.split(key, 18)
    bn_eps = 1e-5
    # BatchNorm eval with default init (weight=1, bias=0, running_mean=0, running_var=1)
    bn_scale = jnp.full((1, CHANNELS), 1.0 / math.sqrt(1.0 + bn_eps), jnp.float32)
    bn_shift = jnp.zeros((1, CHANNELS), jnp.float32)
    return {
        # GINEConv: lin(edge_attr) with edge_attr == 0 -> bias only
        "b_edge": _init(ks[0], (1, CHANNELS)),
        "gin_w1": _init(ks[1], (CHANNELS, CHANNELS)),
        "gin_b1": _init(ks[2], (1, CHANNELS)),
        "gin_w2": _init(ks[3], (CHANNELS, CHANNELS)),
        "gin_b2": _init(ks[4], (1, CHANNELS)),
        # nn.MultiheadAttention: in_proj split into q/k/v + out_proj, all (in, out)
        "w_q": _init(ks[5], (CHANNELS, CHANNELS)),
        "b_q": _init(ks[6], (1, CHANNELS)),
        "w_k": _init(ks[7], (CHANNELS, CHANNELS)),
        "b_k": _init(ks[8], (1, CHANNELS)),
        "w_v": _init(ks[9], (CHANNELS, CHANNELS)),
        "b_v": _init(ks[10], (1, CHANNELS)),
        "w_o": _init(ks[11], (CHANNELS, CHANNELS)),
        "b_o": _init(ks[12], (1, CHANNELS)),
        # BatchNorm1/2/3 (eval-mode, pre-folded to scale/shift rows)
        "bn1_scale": bn_scale, "bn1_shift": bn_shift,
        "bn2_scale": bn_scale, "bn2_shift": bn_shift,
        "bn3_scale": bn_scale, "bn3_shift": bn_shift,
        # GPSConv MLP: Linear(C, 2C) -> ReLU -> Linear(2C, C)
        "mlp_w1": _init(ks[13], (CHANNELS, 2 * CHANNELS)),
        "mlp_b1": _init(ks[14], (1, 2 * CHANNELS)),
        "mlp_w2": _init(ks[15], (2 * CHANNELS, CHANNELS)),
        "mlp_b2": _init(ks[16], (1, CHANNELS)),
    }


# ----------------------------------------------------------------------------
# Main
# ----------------------------------------------------------------------------
if __name__ == "__main__":
    key = jax.random.PRNGKey(0)
    k_src, k_dst, k_emb_w, k_emb_b, k_p1, k_p2 = jax.random.split(key, 6)

    N = 16        # number of graph nodes
    E = 24        # number of edges

    # node features: identity matrix (as in the module: torch.eye)
    x = jnp.eye(N, dtype=jnp.float32)

    # random edge_index (2, E)
    src = jax.random.randint(k_src, (E,), 0, N)
    dst = jax.random.randint(k_dst, (E,), 0, N)
    edge_index = jnp.stack([src, dst])

    # dense aggregation matrix: adj[i, j] = # edges j -> i (source_to_target flow)
    # (bf16-exact as long as per-pair edge multiplicities stay small)
    adj = jnp.zeros((N, N), jnp.float32).at[edge_index[1], edge_index[0]].add(1.0)

    # emb: Linear(N -> 32), weights pre-transposed to (in, out)
    w_emb = 0.1 * jax.random.normal(k_emb_w, (N, CHANNELS), dtype=jnp.float32)
    b_emb = 0.1 * jax.random.normal(k_emb_b, (CHANNELS,), dtype=jnp.float32)

    params1 = init_gps_params(k_p1)
    params2 = init_gps_params(k_p2)

    # one-time host packing (slabs, masks, bf16 casts, BN/scale folding)
    packed = pack_inputs(x, adj, w_emb, b_emb, params1, params2)

    out = graph_transformer_forward(packed, eps1=0.0, eps2=0.0)
    out = jax.block_until_ready(out)

    assert out.shape == (N, CHANNELS)
    assert bool(jnp.all(jnp.isfinite(out)))
    print("KERNEL_OK")
</pallas_src>

<mosaic_0001>
module attributes {stable_mosaic.version = 11 : i64} {
  func.func @_fused_forward_kernel(%arg0: memref<16x16xbf16, #tpu.memory_space<vmem>>, %arg1: memref<16x16xbf16, #tpu.memory_space<vmem>>, %arg2: memref<16x32xbf16, #tpu.memory_space<vmem>>, %arg3: memref<64x32xf32, #tpu.memory_space<vmem>>, %arg4: memref<16x64xbf16, #tpu.memory_space<vmem>>, %arg5: memref<128x128xbf16, #tpu.memory_space<vmem>>, %arg6: memref<96x128xf32, #tpu.memory_space<vmem>>, %arg7: memref<128x128xbf16, #tpu.memory_space<vmem>>, %arg8: memref<96x128xf32, #tpu.memory_space<vmem>>, %arg9: memref<16x32xf32, #tpu.memory_space<vmem>>) attributes {dimension_semantics = [], scalar_prefetch = 0 : i64, scratch_operands = 0 : i64, tpu.core_type = #tpu.core_type<tc>} {
    %c0 = arith.constant 0 : index
    %c0_0 = arith.constant 0 : index
    %0 = vector.load %arg1[%c0, %c0_0] : memref<16x16xbf16, #tpu.memory_space<vmem>>, vector<16x16xbf16>
    %c0_1 = arith.constant 0 : index
    %c0_2 = arith.constant 0 : index
    %1 = vector.load %arg3[%c0_1, %c0_2] : memref<64x32xf32, #tpu.memory_space<vmem>>, vector<64x32xf32>
    %c0_3 = arith.constant 0 : index
    %c0_4 = arith.constant 0 : index
    %2 = vector.load %arg4[%c0_3, %c0_4] : memref<16x64xbf16, #tpu.memory_space<vmem>>, vector<16x64xbf16>
    %c0_5 = arith.constant 0 : index
    %c0_6 = arith.constant 0 : index
    %3 = vector.load %arg0[%c0_5, %c0_6] : memref<16x16xbf16, #tpu.memory_space<vmem>>, vector<16x16xbf16>
    %c0_7 = arith.constant 0 : index
    %c0_8 = arith.constant 0 : index
    %4 = vector.load %arg2[%c0_7, %c0_8] : memref<16x32xbf16, #tpu.memory_space<vmem>>, vector<16x32xbf16>
    %cst = arith.constant dense<0.000000e+00> : vector<16x32xf32>
    %5 = tpu.matmul %3, %4, %cst {dimension_numbers = #tpu.dot_dimension_numbers<[1], [0], [0], [1], [0, 0, 1, 1], [], []>} : vector<16x16xbf16>, vector<16x32xbf16>, vector<16x32xf32> -> vector<16x32xf32>
    %c88 = arith.constant 88 : index
    %c0_9 = arith.constant 0 : index
    %6 = vector.load %arg6[%c88, %c0_9] : memref<96x128xf32, #tpu.memory_space<vmem>>, vector<1x32xf32>
    %7 = vector.broadcast %6 : vector<1x32xf32> to vector<16x32xf32>
    %8 = arith.addf %5, %7 : vector<16x32xf32>
    %9 = arith.truncf %8 : vector<16x32xf32> to vector<16x32xbf16>
    %c0_10 = arith.constant 0 : index
    %c0_11 = arith.constant 0 : index
    %10 = vector.load %arg5[%c0_10, %c0_11] : memref<128x128xbf16, #tpu.memory_space<vmem>>, vector<32x96xbf16>
    %c0_12 = arith.constant 0 : index
    %c96 = arith.constant 96 : index
    %11 = vector.load %arg5[%c0_12, %c96] : memref<128x128xbf16, #tpu.memory_space<vmem>>, vector<32x32xbf16>
    %c32 = arith.constant 32 : index
    %c0_13 = arith.constant 0 : index
    %12 = vector.load %arg5[%c32, %c0_13] : memref<128x128xbf16, #tpu.memory_space<vmem>>, vector<32x32xbf16>
    %c32_14 = arith.constant 32 : index
    %c32_15 = arith.constant 32 : index
    %13 = vector.load %arg5[%c32_14, %c32_15] : memref<128x128xbf16, #tpu.memory_space<vmem>>, vector<32x32xbf16>
    %c32_16 = arith.constant 32 : index
    %c64 = arith.constant 64 : index
    %14 = vector.load %arg5[%c32_16, %c64] : memref<128x128xbf16, #tpu.memory_space<vmem>>, vector<32x64xbf16>
    %c64_17 = arith.constant 64 : index
    %c0_18 = arith.constant 0 : index
    %15 = vector.load %arg5[%c64_17, %c0_18] : memref<128x128xbf16, #tpu.memory_space<vmem>>, vector<64x32xbf16>
    %c0_19 = arith.constant 0 : index
    %c0_20 = arith.constant 0 : index
    %16 = vector.load %arg6[%c0_19, %c0_20] : memref<96x128xf32, #tpu.memory_space<vmem>>, vector<1x32xf32>
    %17 = vector.broadcast %16 : vector<1x32xf32> to vector<16x32xf32>
    %18 = arith.addf %8, %17 : vector<16x32xf32>
    %cst_21 = arith.constant 0.000000e+00 : f32
    %19 = vector.broadcast %cst_21 : f32 to vector<16x32xf32>
    %20 = arith.maximumf %18, %19 : vector<16x32xf32>
    %21 = arith.truncf %20 : vector<16x32xf32> to vector<16x32xbf16>
    %cst_22 = arith.constant dense<0.000000e+00> : vector<16x32xf32>
    %22 = tpu.matmul %0, %21, %cst_22 {dimension_numbers = #tpu.dot_dimension_numbers<[1], [0], [0], [1], [0, 0, 1, 1], [], []>} : vector<16x16xbf16>, vector<16x32xbf16>, vector<16x32xf32> -> vector<16x32xf32>
    %23 = arith.addf %22, %8 : vector<16x32xf32>
    %24 = arith.truncf %23 : vector<16x32xf32> to vector<16x32xbf16>
    %cst_23 = arith.constant dense<0.000000e+00> : vector<16x32xf32>
    %25 = tpu.matmul %24, %11, %cst_23 {dimension_numbers = #tpu.dot_dimension_numbers<[1], [0], [0], [1], [0, 0, 1, 1], [], []>} : vector<16x32xbf16>, vector<32x32xbf16>, vector<16x32xf32> -> vector<16x32xf32>
    %c8 = arith.constant 8 : index
    %c0_24 = arith.constant 0 : index
    %26 = vector.load %arg6[%c8, %c0_24] : memref<96x128xf32, #tpu.memory_space<vmem>>, vector<1x32xf32>
    %27 = vector.broadcast %26 : vector<1x32xf32> to vector<16x32xf32>
    %28 = arith.addf %25, %27 : vector<16x32xf32>
    %cst_25 = arith.constant 0.000000e+00 : f32
    %29 = vector.broadcast %cst_25 : f32 to vector<16x32xf32>
    %30 = arith.maximumf %28, %29 : vector<16x32xf32>
    %31 = arith.truncf %30 : vector<16x32xf32> to vector<16x32xbf16>
    %cst_26 = arith.constant dense<0.000000e+00> : vector<16x32xf32>
    %32 = tpu.matmul %31, %12, %cst_26 {dimension_numbers = #tpu.dot_dimension_numbers<[1], [0], [0], [1], [0, 0, 1, 1], [], []>} : vector<16x32xbf16>, vector<32x32xbf16>, vector<16x32xf32> -> vector<16x32xf32>
    %c16 = arith.constant 16 : index
    %c0_27 = arith.constant 0 : index
    %33 = vector.load %arg6[%c16, %c0_27] : memref<96x128xf32, #tpu.memory_space<vmem>>, vector<1x32xf32>
    %34 = vector.broadcast %33 : vector<1x32xf32> to vector<16x32xf32>
    %35 = arith.addf %32, %34 : vector<16x32xf32>
    %cst_28 = arith.constant dense<0.000000e+00> : vector<16x96xf32>
    %36 = tpu.matmul %9, %10, %cst_28 {dimension_numbers = #tpu.dot_dimension_numbers<[1], [0], [0], [1], [0, 0, 1, 1], [], []>} : vector<16x32xbf16>, vector<32x96xbf16>, vector<16x96xf32> -> vector<16x96xf32>
    %c24 = arith.constant 24 : index
    %c0_29 = arith.constant 0 : index
    %37 = vector.load %arg6[%c24, %c0_29] : memref<96x128xf32, #tpu.memory_space<vmem>>, vector<1x96xf32>
    %38 = vector.broadcast %37 : vector<1x96xf32> to vector<16x96xf32>
    %39 = arith.addf %36, %38 : vector<16x96xf32>
    %40 = vector.extract_strided_slice %39 {offsets = [0, 0], sizes = [16, 32], strides = [1, 1]} : vector<16x96xf32> to vector<16x32xf32>
    %41 = vector.extract_strided_slice %39 {offsets = [0, 32], sizes = [16, 32], strides = [1, 1]} : vector<16x96xf32> to vector<16x32xf32>
    %42 = vector.extract_strided_slice %39 {offsets = [0, 64], sizes = [16, 32], strides = [1, 1]} : vector<16x96xf32> to vector<16x32xf32>
    %43 = tpu.concatenate %40, %40, %40, %40 in 0 : vector<16x32xf32>, vector<16x32xf32>, vector<16x32xf32>, vector<16x32xf32> -> vector<64x32xf32>
    %44 = arith.mulf %43, %1 : vector<64x32xf32>
    %45 = arith.truncf %44 : vector<64x32xf32> to vector<64x32xbf16>
    %46 = arith.truncf %41 : vector<16x32xf32> to vector<16x32xbf16>
    %cst_30 = arith.constant dense<0.000000e+00> : vector<64x16xf32>
    %47 = tpu.matmul %45, %46, %cst_30 {dimension_numbers = #tpu.dot_dimension_numbers<[1], [1], [0], [0], [0, 0, 1, 0], [], []>} : vector<64x32xbf16>, vector<16x32xbf16>, vector<64x16xf32> -> vector<64x16xf32>
    %cst_31 = arith.constant dense<0xFF800000> : vector<64xf32>
    %48 = vector.multi_reduction <maximumf>, %47, %cst_31 [1] : vector<64x16xf32> to vector<64xf32>
    %49 = vector.shape_cast %48 : vector<64xf32> to vector<64x1xf32>
    %50 = vector.broadcast %49 : vector<64x1xf32> to vector<64x16xf32>
    %51 = arith.subf %47, %50 : vector<64x16xf32>
    %52 = math.exp %51 : vector<64x16xf32>
    %cst_32 = arith.constant dense<0.000000e+00> : vector<64xf32>
    %53 = vector.multi_reduction <add>, %52, %cst_32 [1] : vector<64x16xf32> to vector<64xf32>
    %54 = vector.shape_cast %53 : vector<64xf32> to vector<64x1xf32>
    %55 = tpu.reciprocal %54 {approx = true} : vector<64x1xf32> -> vector<64x1xf32>
    %56 = vector.broadcast %55 : vector<64x1xf32> to vector<64x16xf32>
    %57 = arith.mulf %52, %56 : vector<64x16xf32>
    %58 = arith.truncf %57 : vector<64x16xf32> to vector<64x16xbf16>
    %59 = arith.truncf %42 : vector<16x32xf32> to vector<16x32xbf16>
    %cst_33 = arith.constant dense<0.000000e+00> : vector<64x32xf32>
    %60 = tpu.matmul %58, %59, %cst_33 {dimension_numbers = #tpu.dot_dimension_numbers<[1], [0], [0], [1], [0, 0, 1, 1], [], []>} : vector<64x16xbf16>, vector<16x32xbf16>, vector<64x32xf32> -> vector<64x32xf32>
    %61 = arith.mulf %60, %1 : vector<64x32xf32>
    %62 = arith.truncf %61 : vector<64x32xf32> to vector<64x32xbf16>
    %cst_34 = arith.constant dense<0.000000e+00> : vector<16x32xf32>
    %63 = tpu.matmul %2, %62, %cst_34 {dimension_numbers = #tpu.dot_dimension_numbers<[1], [0], [0], [1], [0, 0, 1, 1], [], []>} : vector<16x64xbf16>, vector<64x32xbf16>, vector<16x32xf32> -> vector<16x32xf32>
    %64 = arith.truncf %63 : vector<16x32xf32> to vector<16x32xbf16>
    %cst_35 = arith.constant dense<0.000000e+00> : vector<16x32xf32>
    %65 = tpu.matmul %64, %13, %cst_35 {dimension_numbers = #tpu.dot_dimension_numbers<[1], [0], [0], [1], [0, 0, 1, 1], [], []>} : vector<16x32xbf16>, vector<32x32xbf16>, vector<16x32xf32> -> vector<16x32xf32>
    %c32_36 = arith.constant 32 : index
    %c0_37 = arith.constant 0 : index
    %66 = vector.load %arg6[%c32_36, %c0_37] : memref<96x128xf32, #tpu.memory_space<vmem>>, vector<1x32xf32>
    %67 = vector.broadcast %66 : vector<1x32xf32> to vector<16x32xf32>
    %68 = arith.addf %65, %67 : vector<16x32xf32>
    %69 = arith.addf %35, %68 : vector<16x32xf32>
    %c40 = arith.constant 40 : index
    %c0_38 = arith.constant 0 : index
    %70 = vector.load %arg6[%c40, %c0_38] : memref<96x128xf32, #tpu.memory_space<vmem>>, vector<1x32xf32>
    %71 = vector.broadcast %70 : vector<1x32xf32> to vector<16x32xf32>
    %72 = arith.mulf %8, %71 : vector<16x32xf32>
    %73 = arith.addf %69, %72 : vector<16x32xf32>
    %c48 = arith.constant 48 : index
    %c0_39 = arith.constant 0 : index
    %74 = vector.load %arg6[%c48, %c0_39] : memref<96x128xf32, #tpu.memory_space<vmem>>, vector<1x32xf32>
    %75 = vector.broadcast %74 : vector<1x32xf32> to vector<16x32xf32>
    %76 = arith.addf %73, %75 : vector<16x32xf32>
    %77 = arith.truncf %76 : vector<16x32xf32> to vector<16x32xbf16>
    %cst_40 = arith.constant dense<0.000000e+00> : vector<16x64xf32>
    %78 = tpu.matmul %77, %14, %cst_40 {dimension_numbers = #tpu.dot_dimension_numbers<[1], [0], [0], [1], [0, 0, 1, 1], [], []>} : vector<16x32xbf16>, vector<32x64xbf16>, vector<16x64xf32> -> vector<16x64xf32>
    %c56 = arith.constant 56 : index
    %c0_41 = arith.constant 0 : index
    %79 = vector.load %arg6[%c56, %c0_41] : memref<96x128xf32, #tpu.memory_space<vmem>>, vector<1x64xf32>
    %80 = vector.broadcast %79 : vector<1x64xf32> to vector<16x64xf32>
    %81 = arith.addf %78, %80 : vector<16x64xf32>
    %cst_42 = arith.constant 0.000000e+00 : f32
    %82 = vector.broadcast %cst_42 : f32 to vector<16x64xf32>
    %83 = arith.maximumf %81, %82 : vector<16x64xf32>
    %84 = arith.truncf %83 : vector<16x64xf32> to vector<16x64xbf16>
    %cst_43 = arith.constant dense<0.000000e+00> : vector<16x32xf32>
    %85 = tpu.matmul %84, %15, %cst_43 {dimension_numbers = #tpu.dot_dimension_numbers<[1], [0], [0], [1], [0, 0, 1, 1], [], []>} : vector<16x64xbf16>, vector<64x32xbf16>, vector<16x32xf32> -> vector<16x32xf32>
    %c64_44 = arith.constant 64 : index
    %c0_45 = arith.constant 0 : index
    %86 = vector.load %arg6[%c64_44, %c0_45] : memref<96x128xf32, #tpu.memory_space<vmem>>, vector<1x32xf32>
    %87 = vector.broadcast %86 : vector<1x32xf32> to vector<16x32xf32>
    %88 = arith.addf %85, %87 : vector<16x32xf32>
    %c72 = arith.constant 72 : index
    %c0_46 = arith.constant 0 : index
    %89 = vector.load %arg6[%c72, %c0_46] : memref<96x128xf32, #tpu.memory_space<vmem>>, vector<1x32xf32>
    %90 = vector.broadcast %89 : vector<1x32xf32> to vector<16x32xf32>
    %91 = arith.mulf %76, %90 : vector<16x32xf32>
    %92 = arith.addf %91, %88 : vector<16x32xf32>
    %c80 = arith.constant 80 : index
    %c0_47 = arith.constant 0 : index
    %93 = vector.load %arg6[%c80, %c0_47] : memref<96x128xf32, #tpu.memory_space<vmem>>, vector<1x32xf32>
    %94 = vector.broadcast %93 : vector<1x32xf32> to vector<16x32xf32>
    %95 = arith.addf %92, %94 : vector<16x32xf32>
    %cst_48 = arith.constant 0.000000e+00 : f32
    %96 = vector.broadcast %cst_48 : f32 to vector<16x32xf32>
    %97 = arith.maximumf %95, %96 : vector<16x32xf32>
    %98 = arith.truncf %97 : vector<16x32xf32> to vector<16x32xbf16>
    %c0_49 = arith.constant 0 : index
    %c0_50 = arith.constant 0 : index
    %99 = vector.load %arg7[%c0_49, %c0_50] : memref<128x128xbf16, #tpu.memory_space<vmem>>, vector<32x96xbf16>
    %c0_51 = arith.constant 0 : index
    %c96_52 = arith.constant 96 : index
    %100 = vector.load %arg7[%c0_51, %c96_52] : memref<128x128xbf16, #tpu.memory_space<vmem>>, vector<32x32xbf16>
    %c32_53 = arith.constant 32 : index
    %c0_54 = arith.constant 0 : index
    %101 = vector.load %arg7[%c32_53, %c0_54] : memref<128x128xbf16, #tpu.memory_space<vmem>>, vector<32x32xbf16>
    %c32_55 = arith.constant 32 : index
    %c32_56 = arith.constant 32 : index
    %102 = vector.load %arg7[%c32_55, %c32_56] : memref<128x128xbf16, #tpu.memory_space<vmem>>, vector<32x32xbf16>
    %c32_57 = arith.constant 32 : index
    %c64_58 = arith.constant 64 : index
    %103 = vector.load %arg7[%c32_57, %c64_58] : memref<128x128xbf16, #tpu.memory_space<vmem>>, vector<32x64xbf16>
    %c64_59 = arith.constant 64 : index
    %c0_60 = arith.constant 0 : index
    %104 = vector.load %arg7[%c64_59, %c0_60] : memref<128x128xbf16, #tpu.memory_space<vmem>>, vector<64x32xbf16>
    %c0_61 = arith.constant 0 : index
    %c0_62 = arith.constant 0 : index
    %105 = vector.load %arg8[%c0_61, %c0_62] : memref<96x128xf32, #tpu.memory_space<vmem>>, vector<1x32xf32>
    %106 = vector.broadcast %105 : vector<1x32xf32> to vector<16x32xf32>
    %107 = arith.addf %97, %106 : vector<16x32xf32>
    %cst_63 = arith.constant 0.000000e+00 : f32
    %108 = vector.broadcast %cst_63 : f32 to vector<16x32xf32>
    %109 = arith.maximumf %107, %108 : vector<16x32xf32>
    %110 = arith.truncf %109 : vector<16x32xf32> to vector<16x32xbf16>
    %cst_64 = arith.constant dense<0.000000e+00> : vector<16x32xf32>
    %111 = tpu.matmul %0, %110, %cst_64 {dimension_numbers = #tpu.dot_dimension_numbers<[1], [0], [0], [1], [0, 0, 1, 1], [], []>} : vector<16x16xbf16>, vector<16x32xbf16>, vector<16x32xf32> -> vector<16x32xf32>
    %112 = arith.addf %111, %97 : vector<16x32xf32>
    %113 = arith.truncf %112 : vector<16x32xf32> to vector<16x32xbf16>
    %cst_65 = arith.constant dense<0.000000e+00> : vector<16x32xf32>
    %114 = tpu.matmul %113, %100, %cst_65 {dimension_numbers = #tpu.dot_dimension_numbers<[1], [0], [0], [1], [0, 0, 1, 1], [], []>} : vector<16x32xbf16>, vector<32x32xbf16>, vector<16x32xf32> -> vector<16x32xf32>
    %c8_66 = arith.constant 8 : index
    %c0_67 = arith.constant 0 : index
    %115 = vector.load %arg8[%c8_66, %c0_67] : memref<96x128xf32, #tpu.memory_space<vmem>>, vector<1x32xf32>
    %116 = vector.broadcast %115 : vector<1x32xf32> to vector<16x32xf32>
    %117 = arith.addf %114, %116 : vector<16x32xf32>
    %cst_68 = arith.constant 0.000000e+00 : f32
    %118 = vector.broadcast %cst_68 : f32 to vector<16x32xf32>
    %119 = arith.maximumf %117, %118 : vector<16x32xf32>
    %120 = arith.truncf %119 : vector<16x32xf32> to vector<16x32xbf16>
    %cst_69 = arith.constant dense<0.000000e+00> : vector<16x32xf32>
    %121 = tpu.matmul %120, %101, %cst_69 {dimension_numbers = #tpu.dot_dimension_numbers<[1], [0], [0], [1], [0, 0, 1, 1], [], []>} : vector<16x32xbf16>, vector<32x32xbf16>, vector<16x32xf32> -> vector<16x32xf32>
    %c16_70 = arith.constant 16 : index
    %c0_71 = arith.constant 0 : index
    %122 = vector.load %arg8[%c16_70, %c0_71] : memref<96x128xf32, #tpu.memory_space<vmem>>, vector<1x32xf32>
    %123 = vector.broadcast %122 : vector<1x32xf32> to vector<16x32xf32>
    %124 = arith.addf %121, %123 : vector<16x32xf32>
    %cst_72 = arith.constant dense<0.000000e+00> : vector<16x96xf32>
    %125 = tpu.matmul %98, %99, %cst_72 {dimension_numbers = #tpu.dot_dimension_numbers<[1], [0], [0], [1], [0, 0, 1, 1], [], []>} : vector<16x32xbf16>, vector<32x96xbf16>, vector<16x96xf32> -> vector<16x96xf32>
    %c24_73 = arith.constant 24 : index
    %c0_74 = arith.constant 0 : index
    %126 = vector.load %arg8[%c24_73, %c0_74] : memref<96x128xf32, #tpu.memory_space<vmem>>, vector<1x96xf32>
    %127 = vector.broadcast %126 : vector<1x96xf32> to vector<16x96xf32>
    %128 = arith.addf %125, %127 : vector<16x96xf32>
    %129 = vector.extract_strided_slice %128 {offsets = [0, 0], sizes = [16, 32], strides = [1, 1]} : vector<16x96xf32> to vector<16x32xf32>
    %130 = vector.extract_strided_slice %128 {offsets = [0, 32], sizes = [16, 32], strides = [1, 1]} : vector<16x96xf32> to vector<16x32xf32>
    %131 = vector.extract_strided_slice %128 {offsets = [0, 64], sizes = [16, 32], strides = [1, 1]} : vector<16x96xf32> to vector<16x32xf32>
    %132 = tpu.concatenate %129, %129, %129, %129 in 0 : vector<16x32xf32>, vector<16x32xf32>, vector<16x32xf32>, vector<16x32xf32> -> vector<64x32xf32>
    %133 = arith.mulf %132, %1 : vector<64x32xf32>
    %134 = arith.truncf %133 : vector<64x32xf32> to vector<64x32xbf16>
    %135 = arith.truncf %130 : vector<16x32xf32> to vector<16x32xbf16>
    %cst_75 = arith.constant dense<0.000000e+00> : vector<64x16xf32>
    %136 = tpu.matmul %134, %135, %cst_75 {dimension_numbers = #tpu.dot_dimension_numbers<[1], [1], [0], [0], [0, 0, 1, 0], [], []>} : vector<64x32xbf16>, vector<16x32xbf16>, vector<64x16xf32> -> vector<64x16xf32>
    %cst_76 = arith.constant dense<0xFF800000> : vector<64xf32>
    %137 = vector.multi_reduction <maximumf>, %136, %cst_76 [1] : vector<64x16xf32> to vector<64xf32>
    %138 = vector.shape_cast %137 : vector<64xf32> to vector<64x1xf32>
    %139 = vector.broadcast %138 : vector<64x1xf32> to vector<64x16xf32>
    %140 = arith.subf %136, %139 : vector<64x16xf32>
    %141 = math.exp %140 : vector<64x16xf32>
    %cst_77 = arith.constant dense<0.000000e+00> : vector<64xf32>
    %142 = vector.multi_reduction <add>, %141, %cst_77 [1] : vector<64x16xf32> to vector<64xf32>
    %143 = vector.shape_cast %142 : vector<64xf32> to vector<64x1xf32>
    %144 = tpu.reciprocal %143 {approx = true} : vector<64x1xf32> -> vector<64x1xf32>
    %145 = vector.broadcast %144 : vector<64x1xf32> to vector<64x16xf32>
    %146 = arith.mulf %141, %145 : vector<64x16xf32>
    %147 = arith.truncf %146 : vector<64x16xf32> to vector<64x16xbf16>
    %148 = arith.truncf %131 : vector<16x32xf32> to vector<16x32xbf16>
    %cst_78 = arith.constant dense<0.000000e+00> : vector<64x32xf32>
    %149 = tpu.matmul %147, %148, %cst_78 {dimension_numbers = #tpu.dot_dimension_numbers<[1], [0], [0], [1], [0, 0, 1, 1], [], []>} : vector<64x16xbf16>, vector<16x32xbf16>, vector<64x32xf32> -> vector<64x32xf32>
    %150 = arith.mulf %149, %1 : vector<64x32xf32>
    %151 = arith.truncf %150 : vector<64x32xf32> to vector<64x32xbf16>
    %cst_79 = arith.constant dense<0.000000e+00> : vector<16x32xf32>
    %152 = tpu.matmul %2, %151, %cst_79 {dimension_numbers = #tpu.dot_dimension_numbers<[1], [0], [0], [1], [0, 0, 1, 1], [], []>} : vector<16x64xbf16>, vector<64x32xbf16>, vector<16x32xf32> -> vector<16x32xf32>
    %153 = arith.truncf %152 : vector<16x32xf32> to vector<16x32xbf16>
    %cst_80 = arith.constant dense<0.000000e+00> : vector<16x32xf32>
    %154 = tpu.matmul %153, %102, %cst_80 {dimension_numbers = #tpu.dot_dimension_numbers<[1], [0], [0], [1], [0, 0, 1, 1], [], []>} : vector<16x32xbf16>, vector<32x32xbf16>, vector<16x32xf32> -> vector<16x32xf32>
    %c32_81 = arith.constant 32 : index
    %c0_82 = arith.constant 0 : index
    %155 = vector.load %arg8[%c32_81, %c0_82] : memref<96x128xf32, #tpu.memory_space<vmem>>, vector<1x32xf32>
    %156 = vector.broadcast %155 : vector<1x32xf32> to vector<16x32xf32>
    %157 = arith.addf %154, %156 : vector<16x32xf32>
    %158 = arith.addf %124, %157 : vector<16x32xf32>
    %c40_83 = arith.constant 40 : index
    %c0_84 = arith.constant 0 : index
    %159 = vector.load %arg8[%c40_83, %c0_84] : memref<96x128xf32, #tpu.memory_space<vmem>>, vector<1x32xf32>
    %160 = vector.broadcast %159 : vector<1x32xf32> to vector<16x32xf32>
    %161 = arith.mulf %97, %160 : vector<16x32xf32>
    %162 = arith.addf %158, %161 : vector<16x32xf32>
    %c48_85 = arith.constant 48 : index
    %c0_86 = arith.constant 0 : index
    %163 = vector.load %arg8[%c48_85, %c0_86] : memref<96x128xf32, #tpu.memory_space<vmem>>, vector<1x32xf32>
    %164 = vector.broadcast %163 : vector<1x32xf32> to vector<16x32xf32>
    %165 = arith.addf %162, %164 : vector<16x32xf32>
    %166 = arith.truncf %165 : vector<16x32xf32> to vector<16x32xbf16>
    %cst_87 = arith.constant dense<0.000000e+00> : vector<16x64xf32>
    %167 = tpu.matmul %166, %103, %cst_87 {dimension_numbers = #tpu.dot_dimension_numbers<[1], [0], [0], [1], [0, 0, 1, 1], [], []>} : vector<16x32xbf16>, vector<32x64xbf16>, vector<16x64xf32> -> vector<16x64xf32>
    %c56_88 = arith.constant 56 : index
    %c0_89 = arith.constant 0 : index
    %168 = vector.load %arg8[%c56_88, %c0_89] : memref<96x128xf32, #tpu.memory_space<vmem>>, vector<1x64xf32>
    %169 = vector.broadcast %168 : vector<1x64xf32> to vector<16x64xf32>
    %170 = arith.addf %167, %169 : vector<16x64xf32>
    %cst_90 = arith.constant 0.000000e+00 : f32
    %171 = vector.broadcast %cst_90 : f32 to vector<16x64xf32>
    %172 = arith.maximumf %170, %171 : vector<16x64xf32>
    %173 = arith.truncf %172 : vector<16x64xf32> to vector<16x64xbf16>
    %cst_91 = arith.constant dense<0.000000e+00> : vector<16x32xf32>
    %174 = tpu.matmul %173, %104, %cst_91 {dimension_numbers = #tpu.dot_dimension_numbers<[1], [0], [0], [1], [0, 0, 1, 1], [], []>} : vector<16x64xbf16>, vector<64x32xbf16>, vector<16x32xf32> -> vector<16x32xf32>
    %c64_92 = arith.constant 64 : index
    %c0_93 = arith.constant 0 : index
    %175 = vector.load %arg8[%c64_92, %c0_93] : memref<96x128xf32, #tpu.memory_space<vmem>>, vector<1x32xf32>
    %176 = vector.broadcast %175 : vector<1x32xf32> to vector<16x32xf32>
    %177 = arith.addf %174, %176 : vector<16x32xf32>
    %c72_94 = arith.constant 72 : index
    %c0_95 = arith.constant 0 : index
    %178 = vector.load %arg8[%c72_94, %c0_95] : memref<96x128xf32, #tpu.memory_space<vmem>>, vector<1x32xf32>
    %179 = vector.broadcast %178 : vector<1x32xf32> to vector<16x32xf32>
    %180 = arith.mulf %165, %179 : vector<16x32xf32>
    %181 = arith.addf %180, %177 : vector<16x32xf32>
    %c80_96 = arith.constant 80 : index
    %c0_97 = arith.constant 0 : index
    %182 = vector.load %arg8[%c80_96, %c0_97] : memref<96x128xf32, #tpu.memory_space<vmem>>, vector<1x32xf32>
    %183 = vector.broadcast %182 : vector<1x32xf32> to vector<16x32xf32>
    %184 = arith.addf %181, %183 : vector<16x32xf32>
    %c0_98 = arith.constant 0 : index
    %c0_99 = arith.constant 0 : index
    %185 = vector.load %arg9[%c0_98, %c0_99] : memref<16x32xf32, #tpu.memory_space<vmem>>, vector<16x32xf32>
    tpu.vector_store %arg9[%c0_98, %c0_99], %184 {strides = array<i32>} : memref<16x32xf32, #tpu.memory_space<vmem>>, vector<16x32xf32>,
    return
  }
}

</mosaic_0001>

<bundles_post_ra>
// kernel: tpu_custom_call.1
= control target key start
LH: loop header
LB: loop body
LE: loop exit
PB: predicated region body
PF: predicated region fallthrough
CT: control target
= control target key end

     0   :  { %14 = vsyncpa [#allocation3], 0  ;;  %s2902_s0 = inlined_call_operand.vmem [shape: bf16[16,16], index: 0, kind: input, shape index: {}]   ;;  %s2903_s1 = inlined_call_operand.vmem [shape: bf16[16,16], index: 1, kind: input, shape index: {}]   ;;  %s2904_s2 = inlined_call_operand.hbm [shape: bf16[16,32], index: 2, kind: input, shape index: {}]   ;;  %s2905_s3 = inlined_call_operand.vmem [shape: f32[64,32], index: 3, kind: input, shape index: {}]   ;;  %s2906_s4 = inlined_call_operand.hbm [shape: bf16[16,64], index: 4, kind: input, shape index: {}]   ;;  %s2907_s5 = inlined_call_operand.hbm [shape: bf16[128,128], index: 5, kind: input, shape index: {}]   ;;  %s2908_s6 = inlined_call_operand.vmem [shape: f32[96,128], index: 6, kind: input, shape index: {}]   ;;  %s2909_s7 = inlined_call_operand.hbm [shape: bf16[128,128], index: 7, kind: input, shape index: {}]   ;;  %s2910_s8 = inlined_call_operand.hbm [shape: f32[96,128], index: 8, kind: input, shape index: {}]   ;;  %s2911_s9 = inlined_call_operand.hbm [shape: f32[16,32], index: 9, kind: output, shape index: {}]  }
   0x1   :  { %15 = vsyncpa [#allocation6], 0 }
   0x2   :  { %16 = vsyncpa [#allocation9], 0 }
   0x3   :  { %17 = vsyncpa [#allocation4], 0  ;;  %s2384_s30 = smov [#allocation5]   ;;  %s2385_s11 = smov [#allocation8]  }
   0x4   :  { %s41_s10 = sshll.u32 %s2384_s30, 4  ;;  %s67_s12 = sshll.u32 %s2385_s11, 4  ;;  %s42_s10 = int_to_ptr.vmem [resolvable:$true] %s41_s10  ;;  %s2448_s12 = int_to_ptr.vmem [resolvable:$true] %s67_s12 }
   0x5   :  { %s2244_s15 = scalar_lea.hbm %s2906_s4, 128 }
   0x6   :  { %p2245_p0 = scmp.ne.s32.totalorder %s2906_s4, %s2244_s15  ;;  %p2248_p1 = scmp.lt.u32.totalorder %s2244_s15, %s2906_s4 }
   0x8   :  { %p2250_p2 = pnand %p2248_p1, %p2245_p0 }
   0xa   :  { %2253 = shalt.err (!%p2250_p2)
}
   0xb   :  { %s2254_s20 = scalar_lea.vmem %s42_s10, 128  ;;  %p2259_p4 = scmp.lt.s32.totalorder %s42_s10, %s42_s10 }
   0xc   :  { %p2255_p3 = scmp.ne.s32.totalorder %s42_s10, %s2254_s20  ;;  %p2260_p5 = scmp.lt.s32.totalorder %s2254_s20, %s2254_s20 }
   0xe   :  { %p2261_p6 = por %p2260_p5, %p2259_p4 }
  0x10   :  { %p2262_p7 = pnand %p2261_p6, %p2255_p3 }
  0x12   :  { %2265 = shalt.err (!%p2262_p7)
}
  0x13   :  { %s2386_s21 = smov 64   ;;  %s2387_s22 = smov 4  }
  0x14   :  { %47 = dma.hbm_to_vmem [thread:$0]  %s2906_s4, 128, %s42_s10, [#allocation6], %s2386_s21, %s2386_s21, %s2387_s22  }
  0x15   :  { %s2266_s27 = scalar_lea.hbm %s2909_s7, 1024 }
  0x16   :  { %p2267_p8 = scmp.ne.s32.totalorder %s2909_s7, %s2266_s27  ;;  %p2270_p9 = scmp.lt.u32.totalorder %s2266_s27, %s2909_s7 }
  0x18   :  { %p2272_p10 = pnand %p2270_p9, %p2267_p8 }
  0x1a   :  { %2275 = shalt.err (!%p2272_p10)
}
  0x1b   :  { %s2276_s13 = scalar_lea.vmem %s2448_s12, 1024  ;;  %p2281_p12 = scmp.lt.s32.totalorder %s2448_s12, %s2448_s12 }
  0x1c   :  { %p2277_p11 = scmp.ne.s32.totalorder %s2448_s12, %s2276_s13  ;;  %p2282_p13 = scmp.lt.s32.totalorder %s2276_s13, %s2276_s13 }
  0x1e   :  { %p2283_p0 = por %p2282_p13, %p2281_p12 }
  0x20   :  { %p2284_p1 = pnand %p2283_p0, %p2277_p11 }
  0x22   :  { %2287 = shalt.err (!%p2284_p1)
}
  0x23   :  { %73 = dma.hbm_to_vmem [thread:$0]  %s2909_s7, 1024, %s2448_s12, [#allocation9], %s2386_s21, %s2386_s21, %s2387_s22  }
  0x24   :  { %s2388_s14 = smov [#allocation2]   ;;  %s2389_s16 = smov [#allocation7]  }
  0x25   :  { %s27_s15 = sshll.u32 %s2388_s14, 4  ;;  %s53_s17 = sshll.u32 %s2389_s16, 4  ;;  %s28_s15 = int_to_ptr.vmem [resolvable:$true] %s27_s15  ;;  %s2485_s17 = int_to_ptr.vmem [resolvable:$true] %s53_s17 }
  0x26   :  { %s2288_s20 = scalar_lea.hbm %s2904_s2, 128 }
  0x27   :  { %p2289_p2 = scmp.ne.s32.totalorder %s2904_s2, %s2288_s20  ;;  %p2292_p3 = scmp.lt.u32.totalorder %s2288_s20, %s2904_s2 }
  0x29   :  { %p2294_p4 = pnand %p2292_p3, %p2289_p2 }
  0x2b   :  { %2297 = shalt.err (!%p2294_p4)
}
  0x2c   :  { %s2298_s7 = scalar_lea.vmem %s28_s15, 128  ;;  %p2303_p6 = scmp.lt.s32.totalorder %s28_s15, %s28_s15 }
  0x2d   :  { %p2299_p5 = scmp.ne.s32.totalorder %s28_s15, %s2298_s7  ;;  %p2304_p7 = scmp.lt.s32.totalorder %s2298_s7, %s2298_s7 }
  0x2f   :  { %p2305_p8 = por %p2304_p7, %p2303_p6 }
  0x31   :  { %p2306_p9 = pnand %p2305_p8, %p2299_p5 }
  0x33   :  { %2309 = shalt.err (!%p2306_p9)
}
  0x34   :  { %33 = dma.hbm_to_vmem [thread:$0]  %s2904_s2, 128, %s28_s15, [#allocation3], %s2386_s21, %s2386_s21, %s2387_s22  }
  0x35   :  { %s2310_s30 = scalar_lea.hbm %s2907_s5, 1024 }
  0x36   :  { %p2311_p10 = scmp.ne.s32.totalorder %s2907_s5, %s2310_s30  ;;  %p2314_p11 = scmp.lt.u32.totalorder %s2310_s30, %s2907_s5 }
  0x38   :  { %p2316_p12 = pnand %p2314_p11, %p2311_p10 }
  0x3a   :  { %2319 = shalt.err (!%p2316_p12)
}
  0x3b   :  { %s2320_s14 = scalar_lea.vmem %s2485_s17, 1024  ;;  %p2325_p0 = scmp.lt.s32.totalorder %s2485_s17, %s2485_s17 }
  0x3c   :  { %p2321_p13 = scmp.ne.s32.totalorder %s2485_s17, %s2320_s14  ;;  %p2326_p1 = scmp.lt.s32.totalorder %s2320_s14, %s2320_s14 }
  0x3e   :  { %p2327_p2 = por %p2326_p1, %p2325_p0 }
  0x40   :  { %p2328_p3 = pnand %p2327_p2, %p2321_p13 }
  0x42   :  { %2331 = shalt.err (!%p2328_p3)
}
  0x43   :  { %59 = dma.hbm_to_vmem [thread:$0]  %s2907_s5, 1024, %s2485_s17, [#allocation6], %s2386_s21, %s2386_s21, %s2387_s22  }
  0x44   :  { %s2390_s16 = smov [#allocation10]   ;;  %s2332_s23 = scalar_lea.hbm %s2910_s8, 1536 }
  0x45   :  { %s79_s18 = sshll.u32 %s2390_s16, 4  ;;  %p2333_p4 = scmp.ne.s32.totalorder %s2910_s8, %s2332_s23  ;;  %s80_s18 = int_to_ptr.vmem [resolvable:$true] %s79_s18 }
  0x46   :  { %p2336_p5 = scmp.lt.u32.totalorder %s2332_s23, %s2910_s8 }
  0x48   :  { %p2338_p6 = pnand %p2336_p5, %p2333_p4 }
  0x4a   :  { %2341 = shalt.err (!%p2338_p6)
}
  0x4b   :  { %s2342_s12 = scalar_lea.vmem %s80_s18, 1536  ;;  %p2347_p8 = scmp.lt.s32.totalorder %s80_s18, %s80_s18 }
  0x4c   :  { %p2343_p7 = scmp.ne.s32.totalorder %s80_s18, %s2342_s12  ;;  %p2348_p9 = scmp.lt.s32.totalorder %s2342_s12, %s2342_s12 }
  0x4e   :  { %p2349_p10 = por %p2348_p9, %p2347_p8 }
  0x50   :  { %p2350_p11 = pnand %p2349_p10, %p2343_p7 }
  0x52   :  { %2353 = shalt.err (!%p2350_p11)
}
  0x53   :  { %s2391_s5 = smov 128   ;;  %s2392_s22 = smov 8  }
  0x54   :  { %85 = dma.hbm_to_vmem [thread:$0]  %s2910_s8, 1536, %s80_s18, [#allocation9], %s2391_s5, %s2391_s5, %s2392_s22  }
  0x55   :  { %2376 = dma.done.wait [#allocation3], 128  }
  0x56   :  { %2377 = vsyncadd [#allocation3], 4294967168 }
  0x57   :  { %2378 = dma.done.wait [#allocation6], 1152  }
  0x58   :  { %2379 = vsyncadd [#allocation6], 4294966144 }
  0x59   :  { %2380 = dma.done.wait [#allocation9], 2560  }
  0x5a   :  { %2381 = vsyncadd [#allocation9], 4294964736  ;;  %v2393_v0 = vmov 0.0   ;;  %vm2394_vm0 = vmmov 0   ;;  %v2158_v1 = vld [vmem:[#allocation2] sm:$0xff]   ;;  %vm134_vm1 = vcmask 130048  }
  0x5b   :  { %1956 = vmatprep.subr.bf16.mxu0 %v2393_v0  ;;  %1958 = vmatprep.mubr.msk.bf16.mxu0 %vm2394_vm0, %v2393_v0  ;;  %v2159_v2 = vld [vmem:[%s2902_s0] sm:$0xff]   ;;  %v2161_v3 = vld [vmem:[#allocation7] sm:$0xff]   ;;  %s2395_s29 = smov 32   ;;  %v2162_v4 = vld [vmem:[#allocation7 + $0x8] sm:$0xff]   ;;  %vm277_vm2 = vcmask 261120   ;;  %s2396_s0 = smov 96  }
  0x5c   :  { %1962 = vmatprep.subr.bf16.mxu1 %v2393_v0  ;;  %1964 = vmatprep.mubr.msk.bf16.mxu1 %vm2394_vm0, %v2393_v0  ;;  %v1804_v5 = vld [vmem:[%s2908_s6 + $0x58] ss:$0 sm:$0xff]  ;;  %v1808_v7 = vld [vmem:[%s2908_s6] ss:$0 sm:$0xff]  ;;  %v2589_v30 = vld [vmem:[#allocation7 + $0x18] sm:$0xff]   ;;  %vm722_vm3 = vcmask 523264  }
  0x5d   :  { %1957 = vmatpush3.bf16.msra.mxu0 %v2158_v1  ;;  %271 = vrot.lane.b32.xlu0 %v2161_v3, %s2395_s29  ;;  %v2568_v19 = vld [vmem:[%s2903_s1] sm:$0xff]   ;;  %v1811_v31 = vld [vmem:[%s2908_s6 + $0x8] ss:$0 sm:$0xff]  ;;  %v1819_v40 = vld [vmem:[%s2908_s6 + $0x18] ss:$0 sm:$0xff] }
  0x5e   :  { %1968 = vmatprep.subr.bf16.mxu0 %v2393_v0  ;;  %v2585_v29 = vld [vmem:[#allocation7 + $0x10] sm:$0xff]   ;;  %v2601_v43 = vld [vmem:[%s2905_s3 + $0x10] sm:$0xff]  ;;  %v2617_v48 = vld [vmem:[%s2905_s3 + $0x18] sm:$0xff] }
  0x5f   :  { %v2607_v46 = vld [vmem:[%s2905_s3] sm:$0xff]  ;;  %v2622_v50 = vld [vmem:[%s2905_s3 + $0x8] sm:$0xff]  ;;  %v2632_v54 = vld [vmem:[%s2905_s3 + $0x30] sm:$0xff] }
  0x60   :  { %1959 = vmatmul.mubr.msk.bf16.vlgmr.msra.gmra.mrb[0].mxu0 %vm134_vm1, %v2159_v2  ;;  %v2612_v47 = vld [vmem:[%s2905_s3 + $0x20] sm:$0xff]  ;;  %v2627_v51 = vld [vmem:[%s2905_s3 + $0x28] sm:$0xff]  ;;  %v2637_v55 = vld [vmem:[%s2905_s3 + $0x38] sm:$0xff] }
  0x61   :  { %1972 = vmatprep.mubr.msk.bf16.mxu0 %vm2394_vm0, %v2393_v0  ;;  %273 = vrot.lane.b32.xlu0 %v2162_v4, %s2395_s29 }
  0xcf   :  { %v272_v11 = vpop.permute.xlu0 %271 }
  0xd0   :  { %1969 = vmatpush3.bf16.msra.mxu0 %v272_v11 }
  0xd1   :  { %1970 = vmatprep.subr.bf16.mxu0 %v2393_v0 }
  0xd3   :  { %v274_v20 = vpop.permute.xlu0 %273 }
  0xd4   :  { %1971 = vmatpush3.bf16.msra.mxu0 %v274_v20 }
  0xd5   :  { %1984 = vmatprep.subr.bf16.mxu0 %v2393_v0 }
 0x133   :  { %v172_v6 = vpop.f32.mrb[0].mxu0 }
 0x134   :  { %v2558_v8 = vadd.f32 %v1804_v5, %v172_v6  ;;  %v1960_v9 = vpop.f32.mrb[1].mxu0 }
 0x135   :  { %v175_v10 = vpop.f32.mrb[2].mxu0 }
 0x136   :  { %v2560_v12 = vadd.f32 %v1804_v5, %v175_v10  ;;  %v1961_v13 = vpop.f32.mrb[3].mxu0  ;;  %v201_v14 = vadd.f32 %v1808_v7, %v2558_v8 }
 0x138   :  { %v202_v15 = vadd.f32 %v1808_v7, %v2560_v12  ;;  %v203_v16 = vmax.f32 %v201_v14, 0.0  ;;  %v179_v28 = vpack.c.bf16 %v2560_v12, %v2558_v8 }
 0x13a   :  { %v204_v17 = vmax.f32 %v202_v15, 0.0 }
 0x13c   :  { %v205_v18 = vpack.c.bf16 %v204_v17, %v203_v16 }
 0x13e   :  { %1963 = vmatpush3.bf16.msra.mxu1 %v205_v18 }
 0x13f   :  { %1976 = vmatprep.subr.bf16.mxu1 %v2393_v0 }
 0x141   :  { %1965 = vmatmul.mubr.msk.bf16.vlgmr.msra.gmra.mrb[0].mxu1 %vm134_vm1, %v2568_v19 }
 0x142   :  { %1980 = vmatprep.mubr.msk.bf16.mxu1 %vm2394_vm0, %v2393_v0  ;;  %1977 = vmatpush3.bf16.msra.mxu1 %v2585_v29 }
 0x143   :  { %1978 = vmatprep.subr.bf16.mxu1 %v2393_v0 }
 0x146   :  { %1979 = vmatpush3.bf16.msra.mxu1 %v2589_v30 }
 0x214   :  { %v248_v21 = vpop.f32.mrb[0].mxu1 }
 0x215   :  { %v1966_v22 = vpop.f32.mrb[1].mxu1  ;;  %v249_v24 = vadd.f32 %v248_v21, %v2558_v8 }
 0x216   :  { %v251_v23 = vpop.f32.mrb[2].mxu1 }
 0x217   :  { %v252_v25 = vadd.f32 %v251_v23, %v2560_v12  ;;  %v1967_v26 = vpop.f32.mrb[3].mxu1 }
 0x219   :  { %v255_v27 = vpack.c.bf16 %v252_v25, %v249_v24 }
 0x21b   :  { %1973 = vmatmul.mubr.msk.bf16.vlgmr.msra.gmra.mrb[4].mxu0 %vm277_vm2, %v255_v27 }
 0x21c   :  { %1985 = vmatpush3.bf16.msra.mxu0 %v2161_v3  ;;  %1988 = vmatprep.mubr.msk.bf16.mxu0 %vm2394_vm0, %v2393_v0 }
 0x21d   :  { %1986 = vmatprep.subr.bf16.mxu0 %v2393_v0 }
 0x220   :  { %1987 = vmatpush3.bf16.msra.mxu0 %v2162_v4 }
 0x223   :  { %1989 = vmatmul.mubr.msk.bf16.vlgmr.msra.gmra.mrb[8].mxu0 %vm277_vm2, %v179_v28 }
 0x2ee   :  { %v315_v32 = vpop.f32.mrb[4].mxu0 }
 0x2ef   :  { %v316_v33 = vadd.f32 %v1811_v31, %v315_v32  ;;  %v1974_v34 = vpop.f32.mrb[5].mxu0 }
 0x2f0   :  { %v318_v35 = vpop.f32.mrb[6].mxu0 }
 0x2f1   :  { %v319_v36 = vadd.f32 %v1811_v31, %v318_v35  ;;  %v1975_v37 = vpop.f32.mrb[7].mxu0  ;;  %v322_v38 = vmax.f32 %v316_v33, 0.0 }
 0x2f3   :  { %v323_v39 = vmax.f32 %v319_v36, 0.0 }
 0x2f5   :  { %v324_v41 = vpack.c.bf16 %v323_v39, %v322_v38 }
 0x2f6   :  { %v430_v42 = vpop.f32.mrb[8].mxu0 }
 0x2f7   :  { %v431_v44 = vadd.f32 %v1819_v40, %v430_v42  ;;  %1981 = vmatmul.mubr.msk.bf16.vlgmr.msra.gmra.mrb[4].mxu1 %vm277_vm2, %v324_v41  ;;  %v1990_v45 = vpop.f32.mrb[9].mxu0 }
 0x2f8   :  { %v433_v49 = vpop.f32.mrb[10].mxu0 }
 0x2f9   :  { %v434_v52 = vadd.f32 %v1819_v40, %v433_v49  ;;  %v1991_v53 = vpop.f32.mrb[11].mxu0  ;;  %v439_v56 = vmul.f32 %v431_v44, %v2601_v43  ;;  %v437_v57 = vmul.f32 %v431_v44, %v2607_v46  ;;  %v441_v58 = vmul.f32 %v431_v44, %v2612_v47 }
 0x2fa   :  { %v443_v63 = vmul.f32 %v431_v44, %v2632_v54 }
 0x2fb   :  { %v440_v59 = vmul.f32 %v434_v52, %v2617_v48  ;;  %v2643_v60 = vpack.c.bf16 %v434_v52, %v431_v44  ;;  %v438_v61 = vmul.f32 %v434_v52, %v2622_v50  ;;  %v442_v62 = vmul.f32 %v434_v52, %v2627_v51 }
 0x2fc   :  { %v444_v1 = vmul.f32 %v434_v52, %v2637_v55 }
 0x2fd   :  { %451 = vrot.lane.b32.xlu1 %v2643_v60, %s2396_s0  ;;  %v445_v2 = vpack.c.bf16 %v438_v61, %v437_v57  ;;  %v446_v3 = vpack.c.bf16 %v440_v59, %v439_v56  ;;  %v447_v4 = vpack.c.bf16 %v442_v62, %v441_v58 }
 0x2fe   :  { %v448_v5 = vpack.c.bf16 %v444_v1, %v443_v63 }
 0x2ff   :  { %1994 = vmatprep.mubr.msk.bf16.mxu1 %vm277_vm2, %v445_v2 }
 0x36f   :  { %v452_v6 = vpop.permute.xlu1 %451 }
 0x370   :  { %v466_v7 = vsel %vm277_vm2, %v452_v6, 0  ;;  %2142 = vmatprep.subr.msk.bf16.mxu1 %vm277_vm2, %v452_v6 }
 0x371   :  { %1993 = vmatpush3.bf16.xpose.msra.mxu1 %v466_v7 }
 0x372   :  { %2012 = vmatprep.subr.bf16.mxu1 %v2393_v0 }
 0x378   :  { %1995 = vmatmul.mubr.msk.bf16.vlgmr.msra.gmra.mrb[8].mxu1 %vm277_vm2, %v446_v3 }
 0x379   :  { %1998 = vmatprep.mubr.msk.bf16.mxu1 %vm277_vm2, %v447_v4 }
 0x380   :  { %1999 = vmatmul.mubr.msk.bf16.gmra.mrb[12].mxu1 %vm277_vm2, %v448_v5 }
 0x381   :  { %2020 = vmatprep.mubr.msk.bf16.mxu1 %vm2394_vm0, %v2393_v0 }
 0x3ca   :  { %v2660_v9 = vpop.f32.mrb[4].mxu1 }
 0x3cb   :  { %v1982_v10 = vpop.f32.mrb[5].mxu1 }
 0x3cc   :  { %v2662_v11 = vpop.f32.mrb[6].mxu1 }
 0x3cd   :  { %v1983_v13 = vpop.f32.mrb[7].mxu1 }
 0x44b   :  { %v1996_v14 = vpop.f32.mrb[8].mxu1 }
 0x44c   :  { %v502_v15 = vpop.f32.mrb[9].mxu1  ;;  %v539_v23 = vsel %vm134_vm1, %v1996_v14, -inf }
 0x44d   :  { %v1997_v16 = vpop.f32.mrb[10].mxu1  ;;  %v533_v17 = vsel %vm134_vm1, %v502_v15, -inf }
 0x44e   :  { %534 = vmax.xlane.f32.xlu1 %v533_v17  ;;  %v505_v18 = vpop.f32.mrb[11].mxu1  ;;  %v542_v21 = vsel %vm134_vm1, %v1997_v16, -inf }
 0x44f   :  { %v536_v20 = vsel %vm134_vm1, %v505_v18, -inf }
 0x450   :  { %537 = vmax.xlane.f32.xlu0 %v536_v20 }
 0x452   :  { %543 = vmax.xlane.f32.xlu1 %v542_v21 }
 0x453   :  { %v2000_v22 = vpop.f32.mrb[12].mxu1 }
 0x454   :  { %540 = vmax.xlane.f32.xlu0 %v539_v23  ;;  %v518_v24 = vpop.f32.mrb[13].mxu1  ;;  %v551_v31 = vsel %vm134_vm1, %v2000_v22, -inf }
 0x455   :  { %v2001_v25 = vpop.f32.mrb[14].mxu1  ;;  %v545_v27 = vsel %vm134_vm1, %v518_v24, -inf }
 0x456   :  { %v521_v26 = vpop.f32.mrb[15].mxu1  ;;  %v554_v32 = vsel %vm134_vm1, %v2001_v25, -inf }
 0x457   :  { %v548_v28 = vsel %vm134_vm1, %v521_v26, -inf }
 0x458   :  { %546 = vmax.xlane.f32.xlu0 %v545_v27  ;;  %549 = vmax.xlane.f32.xlu1 %v548_v28 }
 0x45c   :  { %552 = vmax.xlane.f32.xlu0 %v551_v31  ;;  %555 = vmax.xlane.f32.xlu1 %v554_v32 }
 0x4db   :  { %v535_v33 = vpop.xlane.xlu1 %534 }
 0x4dc   :  { %v557_v37 = vsub.f32 %v502_v15, %v535_v33 }
 0x4dd   :  { %v538_v34 = vpop.xlane.xlu0 %537 }
 0x4de   :  { %v558_v35 = vsub.f32 %v505_v18, %v538_v34  ;;  %v565_v44 = vmul.f32 1.442695, %v557_v37 }
 0x4df   :  { %v544_v36 = vpop.xlane.xlu1 %543 }
 0x4e0   :  { %v567_v38 = vmul.f32 1.442695, %v558_v35  ;;  %v560_v39 = vsub.f32 %v1997_v16, %v544_v36 }
 0x4e1   :  { %v541_v40 = vpop.xlane.xlu0 %540 }
 0x4e2   :  { %2178 = vpow2.f32 %v567_v38  ;;  %v571_v41 = vmul.f32 1.442695, %v560_v39  ;;  %v559_v42 = vsub.f32 %v1996_v14, %v541_v40 }
 0x4e4   :  { %2180 = vpow2.f32 %v571_v41  ;;  %v569_v45 = vmul.f32 1.442695, %v559_v42 }
 0x4e5   :  { %v547_v49 = vpop.xlane.xlu0 %546  ;;  %v550_v52 = vpop.xlane.xlu1 %549 }
 0x4e6   :  { %2182 = vpow2.f32 %v569_v45  ;;  %v562_v53 = vsub.f32 %v521_v26, %v550_v52  ;;  %v561_v56 = vsub.f32 %v518_v24, %v547_v49 }
 0x4e7   :  { %2184 = vpow2.f32 %v565_v44 }
 0x4e8   :  { %v575_v57 = vmul.f32 1.442695, %v562_v53  ;;  %v573_v1 = vmul.f32 1.442695, %v561_v56 }
 0x4e9   :  { %v553_v58 = vpop.xlane.xlu0 %552  ;;  %v556_v59 = vpop.xlane.xlu1 %555 }
 0x4ea   :  { %v563_v61 = vsub.f32 %v2000_v22, %v553_v58  ;;  %v564_v62 = vsub.f32 %v2001_v25, %v556_v59  ;;  %2186 = vpow2.f32 %v575_v57 }
 0x4ec   :  { %v2179_v63 = vpop.eup %2178  ;;  %v577_v2 = vmul.f32 1.442695, %v563_v61  ;;  %v579_v3 = vmul.f32 1.442695, %v564_v62 }
 0x4ed   :  { %v584_v4 = vsel %vm134_vm1, %v2179_v63, 0.0 }
 0x4ee   :  { %v2181_v5 = vpop.eup %2180  ;;  %2188 = vpow2.f32 %v577_v2  ;;  %585 = vadd.xlane.f32.xlu1 %v584_v4 }
 0x4ef   :  { %2190 = vpow2.f32 %v579_v3  ;;  %v590_v10 = vsel %vm134_vm1, %v2181_v5, 0.0 }
 0x4f0   :  { %v2183_v6 = vpop.eup %2182  ;;  %2192 = vpow2.f32 %v573_v1 }
 0x4f1   :  { %v587_v7 = vsel %vm134_vm1, %v2183_v6, 0.0  ;;  %v2185_v13 = vpop.eup %2184 }
 0x4f2   :  { %588 = vadd.xlane.f32.xlu0 %v587_v7  ;;  %591 = vadd.xlane.f32.xlu1 %v590_v10  ;;  %v581_v15 = vsel %vm134_vm1, %v2185_v13, 0.0 }
 0x4f4   :  { %v2187_v14 = vpop.eup %2186 }
 0x4f5   :  { %v596_v16 = vsel %vm134_vm1, %v2187_v14, 0.0 }
 0x4f6   :  { %582 = vadd.xlane.f32.xlu0 %v581_v15  ;;  %597 = vadd.xlane.f32.xlu1 %v596_v16 }
 0x4f8   :  { %v2189_v17 = vpop.eup %2188 }
 0x4f9   :  { %v2191_v18 = vpop.eup %2190  ;;  %v599_v20 = vsel %vm134_vm1, %v2189_v17, 0.0 }
 0x4fa   :  { %v2193_v21 = vpop.eup %2192  ;;  %600 = vadd.xlane.f32.xlu0 %v599_v20  ;;  %v602_v22 = vsel %vm134_vm1, %v2191_v18, 0.0 }
 0x4fb   :  { %603 = vadd.xlane.f32.xlu1 %v602_v22  ;;  %v593_v23 = vsel %vm134_vm1, %v2193_v21, 0.0 }
 0x4fe   :  { %594 = vadd.xlane.f32.xlu0 %v593_v23 }
 0x50c   :  { %773 = vrot.lane.b32.xlu1 %v2585_v29, %s2396_s0 }
 0x510   :  { %775 = vrot.lane.b32.xlu1 %v2589_v30, %s2396_s0 }
 0x514   :  { %625 = vrot.lane.b32.xlu0 %v2643_v60, %s2386_s21  ;;  %849 = vrot.lane.b32.xlu1 %v2589_v30, %s2386_s21 }
 0x518   :  { %847 = vrot.lane.b32.xlu0 %v2585_v29, %s2386_s21 }
 0x57b   :  { %v586_v24 = vpop.xlane.xlu1 %585 }
 0x57f   :  { %v589_v25 = vpop.xlane.xlu0 %588  ;;  %v592_v26 = vpop.xlane.xlu1 %591 }
 0x580   :  { %2194 = vrcp.f32 %v589_v25 }
 0x581   :  { %2196 = vrcp.f32 %v592_v26 }
 0x582   :  { %2198 = vrcp.f32 %v586_v24  ;;  %v2709_v24 = vld [vmem:[#allocation5] sm:$0xff]  }
 0x583   :  { %v583_v27 = vpop.xlane.xlu0 %582  ;;  %v598_v28 = vpop.xlane.xlu1 %597 }
 0x584   :  { %2200 = vrcp.f32 %v583_v27 }
 0x587   :  { %v601_v31 = vpop.xlane.xlu0 %600 }
 0x588   :  { %2202 = vrcp.f32 %v601_v31  ;;  %v604_v32 = vpop.xlane.xlu1 %603 }
 0x589   :  { %2204 = vrcp.f32 %v604_v32 }
 0x58a   :  { %v2195_v60 = vpop.eup %2194  ;;  %2206 = vrcp.f32 %v598_v28 }
 0x58b   :  { %v2197_v33 = vpop.eup %2196  ;;  %v595_v30 = vpop.xlane.xlu0 %594  ;;  %v615_v35 = vmul.f32 %v2195_v60, %v2183_v6 }
 0x58c   :  { %v2199_v34 = vpop.eup %2198  ;;  %2208 = vrcp.f32 %v595_v30  ;;  %v616_v36 = vmul.f32 %v2197_v33, %v2181_v5  ;;  %v774_v61 = vpop.permute.xlu1 %773  ;;  %v2166_v30 = vld [vmem:[#allocation7 + $0x20] sm:$0xff]  }
 0x58d   :  { %v614_v39 = vmul.f32 %v2199_v34, %v2179_v63  ;;  %v2167_v34 = vld [vmem:[#allocation7 + $0x28] sm:$0xff]  }
 0x58e   :  { %v2201_v29 = vpop.eup %2200  ;;  %v622_v42 = vpack.c.bf16 %v616_v36, %v615_v35  ;;  %v1831_v35 = vld [vmem:[%s2908_s6 + $0x20] ss:$0 sm:$0xff] }
 0x58f   :  { %v626_v37 = vpop.permute.xlu0 %625  ;;  %v613_v38 = vmul.f32 %v2201_v29, %v2185_v13  ;;  %v1815_v29 = vld [vmem:[%s2908_s6 + $0x10] ss:$0 sm:$0xff] }
 0x590   :  { %2002 = vmatprep.subr.bf16.mxu0 %v626_v37  ;;  %v776_v25 = vpop.permute.xlu1 %775 }
 0x591   :  { %2003 = vmatpush3.bf16.msra.mxu0 %v626_v37  ;;  %v621_v40 = vpack.c.bf16 %v614_v39, %v613_v38  ;;  %v1833_v37 = vld [vmem:[%s2908_s6 + $0x28] ss:$0 sm:$0xff]  ;;  %v380_v38 = vadd.f32 %v1815_v29, %v2660_v9 }
 0x592   :  { %v2203_v41 = vpop.eup %2202  ;;  %2024 = vmatprep.subr.bf16.mxu0 %v2393_v0 }
 0x593   :  { %v2205_v44 = vpop.eup %2204  ;;  %2004 = vmatprep.mubr.msk.bf16.mxu0 %vm134_vm1, %v621_v40  ;;  %v619_v52 = vmul.f32 %v2203_v41, %v2189_v17  ;;  %v848_v60 = vpop.permute.xlu0 %847 }
 0x594   :  { %v2207_v45 = vpop.eup %2206  ;;  %2005 = vmatmul.mubr.msk.bf16.vlgmr.msra.gmra.mrb[12].mxu0 %vm134_vm1, %v622_v42  ;;  %v620_v53 = vmul.f32 %v2205_v44, %v2191_v18  ;;  %v850_v33 = vpop.permute.xlu1 %849  ;;  %v383_v42 = vadd.f32 %v1815_v29, %v2662_v11  ;;  %v2169_v11 = vld [vmem:[#allocation7 + $0x38] sm:$0xff]  }
 0x595   :  { %v618_v57 = vmul.f32 %v2207_v45, %v2187_v14  ;;  %2025 = vmatpush3.bf16.msra.mxu0 %v774_v61  ;;  %v830_v45 = vmul.f32 %v1833_v37, %v2558_v8  ;;  %v2168_v8 = vld [vmem:[#allocation7 + $0x30] sm:$0xff]  }
 0x596   :  { %v2209_v49 = vpop.eup %2208  ;;  %v624_v59 = vpack.c.bf16 %v620_v53, %v619_v52  ;;  %2026 = vmatprep.subr.bf16.mxu0 %v2393_v0 }
 0x597   :  { %v617_v56 = vmul.f32 %v2209_v49, %v2193_v21 }
 0x599   :  { %v623_v58 = vpack.c.bf16 %v618_v57, %v617_v56  ;;  %2027 = vmatpush3.bf16.msra.mxu0 %v776_v25  ;;  %v831_v57 = vmul.f32 %v1833_v37, %v2560_v12  ;;  %v1835_v12 = vld [vmem:[%s2908_s6 + $0x38] ss:$0 sm:$0xff] }
 0x59a   :  { %2040 = vmatprep.subr.bf16.mxu0 %v2393_v0 }
 0x59b   :  { %2008 = vmatprep.mubr.msk.bf16.mxu0 %vm134_vm1, %v623_v58  ;;  %v1834_v58 = vld [vmem:[%s2908_s6 + $0x30] ss:$0 sm:$0xff] }
 0x59c   :  { %2009 = vmatmul.mubr.msk.bf16.gmra.mrb[16].mxu0 %vm134_vm1, %v624_v59 }
 0x59d   :  { %2028 = vmatprep.mubr.msk.bf16.mxu0 %vm2394_vm0, %v2393_v0 }
 0x667   :  { %v2006_v62 = vpop.f32.mrb[12].mxu0 }
 0x668   :  { %v674_v63 = vpop.f32.mrb[13].mxu0  ;;  %v707_v2 = vmul.f32 %v2006_v62, %v2601_v43 }
 0x669   :  { %v2007_v1 = vpop.f32.mrb[14].mxu0  ;;  %v705_v5 = vmul.f32 %v674_v63, %v2607_v46 }
 0x66a   :  { %v708_v3 = vmul.f32 %v2007_v1, %v2617_v48  ;;  %v677_v4 = vpop.f32.mrb[15].mxu0 }
 0x66b   :  { %v706_v6 = vmul.f32 %v677_v4, %v2622_v50 }
 0x66c   :  { %v714_v7 = vpack.c.bf16 %v708_v3, %v707_v2 }
 0x66d   :  { %v713_v10 = vpack.c.bf16 %v706_v6, %v705_v5 }
 0x66f   :  { %v2010_v13 = vpop.f32.mrb[16].mxu0  ;;  %2013 = vmatpush3.bf16.msra.mxu1 %v713_v10 }
 0x670   :  { %v690_v14 = vpop.f32.mrb[17].mxu0  ;;  %2014 = vmatprep.subr.bf16.mxu1 %v2393_v0  ;;  %v711_v16 = vmul.f32 %v2010_v13, %v2632_v54  ;;  %v2170_v13 = vld [vmem:[#allocation8] sm:$0xff]  }
 0x671   :  { %v2011_v15 = vpop.f32.mrb[18].mxu0  ;;  %v709_v20 = vmul.f32 %v690_v14, %v2612_v47  ;;  %v2171_v14 = vld [vmem:[#allocation8 + $0x8] sm:$0xff]   ;;  %1075 = vrot.lane.b32.xlu0 %v2170_v13, %s2395_s29 }
 0x672   :  { %v712_v17 = vmul.f32 %v2011_v15, %v2637_v55  ;;  %v693_v18 = vpop.f32.mrb[19].mxu0  ;;  %1077 = vrot.lane.b32.xlu1 %v2171_v14, %s2395_s29  ;;  %v1837_v15 = vld [vmem:[%s2908_s6 + $0x40] ss:$0 sm:$0xff] }
 0x673   :  { %v710_v21 = vmul.f32 %v693_v18, %v2627_v51  ;;  %2015 = vmatpush3.bf16.msra.mxu1 %v714_v7 }
 0x674   :  { %v716_v22 = vpack.c.bf16 %v712_v17, %v711_v16  ;;  %2016 = vmatprep.subr.bf16.mxu1 %v2393_v0  ;;  %v1843_v16 = vld [vmem:[%s2908_s6 + $0x48] ss:$0 sm:$0xff] }
 0x675   :  { %v715_v23 = vpack.c.bf16 %v710_v21, %v709_v20 }
 0x677   :  { %2017 = vmatpush3.bf16.msra.mxu1 %v715_v23 }
 0x678   :  { %2018 = vmatprep.subr.bf16.mxu1 %v2393_v0 }
 0x67b   :  { %2019 = vmatpush3.bf16.msra.mxu1 %v716_v22  ;;  %v1844_v22 = vld [vmem:[%s2908_s6 + $0x50] ss:$0 sm:$0xff] }
 0x67c   :  { %2032 = vmatprep.subr.bf16.mxu1 %v2393_v0 }
 0x67e   :  { %2021 = vmatmul.mubr.msk.bf16.vlgmr.msra.gmra.mrb[16].mxu1 %vm722_vm3, %v2709_v24 }
 0x67f   :  { %2036 = vmatprep.mubr.msk.bf16.mxu1 %vm2394_vm0, %v2393_v0  ;;  %2033 = vmatpush3.bf16.msra.mxu1 %v848_v60  ;;  %v1845_v60 = vld [vmem:[#allocation10] ss:$0 sm:$0xff] }
 0x680   :  { %2034 = vmatprep.subr.bf16.mxu1 %v2393_v0 }
 0x683   :  { %2035 = vmatpush3.bf16.msra.mxu1 %v850_v33 }
 0x684   :  { %2052 = vmatprep.subr.bf16.mxu1 %v2393_v0 }
 0x751   :  { %v760_v26 = vpop.f32.mrb[16].mxu1 }
 0x752   :  { %v2022_v27 = vpop.f32.mrb[17].mxu1 }
 0x753   :  { %v763_v28 = vpop.f32.mrb[18].mxu1 }
 0x754   :  { %v767_v31 = vpack.c.bf16 %v763_v28, %v760_v26  ;;  %v2023_v32 = vpop.f32.mrb[19].mxu1 }
 0x756   :  { %2029 = vmatmul.mubr.msk.bf16.vlgmr.msra.gmra.mrb[20].mxu0 %vm277_vm2, %v767_v31 }
 0x757   :  { %2048 = vmatprep.mubr.msk.bf16.mxu0 %vm2394_vm0, %v2393_v0  ;;  %2041 = vmatpush3.bf16.msra.mxu0 %v2166_v30 }
 0x758   :  { %2042 = vmatprep.subr.bf16.mxu0 %v2393_v0 }
 0x75b   :  { %2043 = vmatpush3.bf16.msra.mxu0 %v2167_v34 }
 0x75c   :  { %2044 = vmatprep.subr.bf16.mxu0 %v2393_v0 }
 0x75f   :  { %2045 = vmatpush3.bf16.msra.mxu0 %v2168_v8 }
 0x760   :  { %2046 = vmatprep.subr.bf16.mxu0 %v2393_v0 }
 0x763   :  { %2047 = vmatpush3.bf16.msra.mxu0 %v2169_v11 }
 0x764   :  { %2066 = vmatprep.subr.bf16.mxu0 %v2393_v0 }
 0x829   :  { %v816_v36 = vpop.f32.mrb[20].mxu0 }
 0x82a   :  { %v817_v39 = vadd.f32 %v1831_v35, %v816_v36  ;;  %v2030_v40 = vpop.f32.mrb[21].mxu0 }
 0x82b   :  { %v819_v41 = vpop.f32.mrb[22].mxu0  ;;  %v1078_v40 = vpop.permute.xlu1 %1077 }
 0x82c   :  { %v823_v44 = vadd.f32 %v817_v39, %v380_v38  ;;  %v820_v49 = vadd.f32 %v1831_v35, %v819_v41  ;;  %v2031_v52 = vpop.f32.mrb[23].mxu0  ;;  %v1076_v39 = vpop.permute.xlu0 %1075 }
 0x82e   :  { %v832_v53 = vadd.f32 %v830_v45, %v823_v44  ;;  %v824_v56 = vadd.f32 %v820_v49, %v383_v42 }
 0x830   :  { %v833_v59 = vadd.f32 %v831_v57, %v824_v56  ;;  %v839_v9 = vadd.f32 %v1834_v58, %v832_v53  ;;  %v2784_v56 = vld [vmem:[#allocation8 + $0x10] sm:$0xff]   ;;  %v2788_v57 = vld [vmem:[#allocation8 + $0x18] sm:$0xff]  }
 0x832   :  { %v840_v61 = vadd.f32 %v1834_v58, %v833_v59  ;;  %v978_v20 = vmul.f32 %v1843_v16, %v839_v9  ;;  %v1847_v58 = vld [vmem:[#allocation10 + $0x8] ss:$0 sm:$0xff] }
 0x834   :  { %v841_v62 = vpack.c.bf16 %v840_v61, %v839_v9  ;;  %v979_v27 = vmul.f32 %v1843_v16, %v840_v61 }
 0x836   :  { %2037 = vmatmul.mubr.msk.bf16.vlgmr.msra.gmra.mrb[20].mxu1 %vm277_vm2, %v841_v62 }
 0x837   :  { %2054 = vmatprep.mubr.msk.bf16.mxu1 %vm2394_vm0, %v2393_v0 }
 0x909   :  { %v890_v63 = vpop.f32.mrb[20].mxu1 }
 0x90a   :  { %v891_v1 = vadd.f32 %v1835_v12, %v890_v63  ;;  %v2038_v2 = vpop.f32.mrb[21].mxu1 }
 0x90b   :  { %v893_v3 = vpop.f32.mrb[22].mxu1 }
 0x90c   :  { %v894_v4 = vadd.f32 %v1835_v12, %v893_v3  ;;  %v2039_v5 = vpop.f32.mrb[23].mxu1  ;;  %v897_v6 = vmax.f32 %v891_v1, 0.0  ;;  %v1855_v1 = vld [vmem:[#allocation10 + $0x18] ss:$0 sm:$0xff] }
 0x90e   :  { %v898_v7 = vmax.f32 %v894_v4, 0.0 }
 0x910   :  { %v899_v10 = vpack.c.bf16 %v898_v7, %v897_v6 }
 0x912   :  { %2049 = vmatmul.mubr.msk.bf16.vlgmr.msra.gmra.mrb[24].mxu0 %vm722_vm3, %v899_v10 }
 0x913   :  { %2070 = vmatprep.mubr.msk.bf16.mxu0 %vm2394_vm0, %v2393_v0  ;;  %2067 = vmatpush3.bf16.msra.mxu0 %v2784_v56 }
 0x914   :  { %2068 = vmatprep.subr.bf16.mxu0 %v2393_v0 }
 0x917   :  { %2069 = vmatpush3.bf16.msra.mxu0 %v2788_v57 }
 0x9e5   :  { %v966_v17 = vpop.f32.mrb[24].mxu0 }
 0x9e6   :  { %v967_v18 = vadd.f32 %v1837_v15, %v966_v17  ;;  %v2050_v21 = vpop.f32.mrb[25].mxu0 }
 0x9e7   :  { %v969_v23 = vpop.f32.mrb[26].mxu0 }
 0x9e8   :  { %v980_v25 = vadd.f32 %v978_v20, %v967_v18  ;;  %v970_v26 = vadd.f32 %v1837_v15, %v969_v23  ;;  %v2051_v28 = vpop.f32.mrb[27].mxu0 }
 0x9ea   :  { %v987_v31 = vadd.f32 %v1844_v22, %v980_v25  ;;  %v981_v32 = vadd.f32 %v979_v27, %v970_v26 }
 0x9ec   :  { %v2762_v33 = vmax.f32 %v987_v31, 0.0  ;;  %v988_v30 = vadd.f32 %v1844_v22, %v981_v32 }
 0x9ee   :  { %v2764_v34 = vmax.f32 %v988_v30, 0.0  ;;  %v1013_v29 = vadd.f32 %v1845_v60, %v2762_v33 }
 0x9f0   :  { %v1014_v35 = vadd.f32 %v1845_v60, %v2764_v34  ;;  %v1015_v36 = vmax.f32 %v1013_v29, 0.0 }
 0x9f2   :  { %v1016_v37 = vmax.f32 %v1014_v35, 0.0 }
 0x9f4   :  { %v1017_v38 = vpack.c.bf16 %v1016_v37, %v1015_v36 }
 0x9f6   :  { %2053 = vmatpush3.bf16.msra.mxu1 %v1017_v38 }
 0x9f7   :  { %2058 = vmatprep.subr.bf16.mxu1 %v2393_v0 }
 0x9f9   :  { %2055 = vmatmul.mubr.msk.bf16.vlgmr.msra.gmra.mrb[24].mxu1 %vm134_vm1, %v2568_v19  ;;  %v991_v19 = vpack.c.bf16 %v2764_v34, %v2762_v33 }
 0x9fa   :  { %2059 = vmatpush3.bf16.msra.mxu1 %v1076_v39  ;;  %2062 = vmatprep.mubr.msk.bf16.mxu1 %vm2394_vm0, %v2393_v0 }
 0x9fb   :  { %2060 = vmatprep.subr.bf16.mxu1 %v2393_v0 }
 0x9fe   :  { %2061 = vmatpush3.bf16.msra.mxu1 %v1078_v40 }
 0x9ff   :  { %2074 = vmatprep.subr.bf16.mxu1 %v2393_v0 }
 0xacc   :  { %v1052_v41 = vpop.f32.mrb[24].mxu1 }
 0xacd   :  { %v2056_v42 = vpop.f32.mrb[25].mxu1  ;;  %v1053_v45 = vadd.f32 %v1052_v41, %v2762_v33 }
 0xace   :  { %v1055_v44 = vpop.f32.mrb[26].mxu1 }
 0xacf   :  { %v1056_v49 = vadd.f32 %v1055_v44, %v2764_v34  ;;  %v2057_v52 = vpop.f32.mrb[27].mxu1 }
 0xad1   :  { %v1059_v53 = vpack.c.bf16 %v1056_v49, %v1053_v45 }
 0xad3   :  { %2063 = vmatmul.mubr.msk.bf16.vlgmr.msra.gmra.mrb[28].mxu1 %vm277_vm2, %v1059_v53 }
 0xad4   :  { %2075 = vmatpush3.bf16.msra.mxu1 %v2170_v13  ;;  %2078 = vmatprep.mubr.msk.bf16.mxu1 %vm2394_vm0, %v2393_v0 }
 0xad5   :  { %2076 = vmatprep.subr.bf16.mxu1 %v2393_v0 }
 0xad8   :  { %2077 = vmatpush3.bf16.msra.mxu1 %v2171_v14 }
 0xadb   :  { %2079 = vmatmul.mubr.msk.bf16.vlgmr.msra.gmra.mrb[32].mxu1 %vm277_vm2, %v991_v19 }
 0xba6   :  { %v1118_v59 = vpop.f32.mrb[28].mxu1 }
 0xba7   :  { %v1119_v9 = vadd.f32 %v1847_v58, %v1118_v59  ;;  %v2064_v61 = vpop.f32.mrb[29].mxu1 }
 0xba8   :  { %v1121_v62 = vpop.f32.mrb[30].mxu1 }
 0xba9   :  { %v1122_v8 = vadd.f32 %v1847_v58, %v1121_v62  ;;  %v2065_v11 = vpop.f32.mrb[31].mxu1  ;;  %v1125_v12 = vmax.f32 %v1119_v9, 0.0 }
 0xbab   :  { %v1126_v63 = vmax.f32 %v1122_v8, 0.0 }
 0xbad   :  { %v1127_v2 = vpack.c.bf16 %v1126_v63, %v1125_v12 }
 0xbae   :  { %v1233_v3 = vpop.f32.mrb[32].mxu1 }
 0xbaf   :  { %v1234_v4 = vadd.f32 %v1855_v1, %v1233_v3  ;;  %2071 = vmatmul.mubr.msk.bf16.vlgmr.msra.gmra.mrb[28].mxu0 %vm277_vm2, %v1127_v2  ;;  %v2080_v5 = vpop.f32.mrb[33].mxu1 }
 0xbb0   :  { %v1236_v6 = vpop.f32.mrb[34].mxu1 }
 0xbb1   :  { %v1237_v7 = vadd.f32 %v1855_v1, %v1236_v6  ;;  %v2081_v10 = vpop.f32.mrb[35].mxu1  ;;  %v1242_v13 = vmul.f32 %v1234_v4, %v2601_v43  ;;  %v1240_v14 = vmul.f32 %v1234_v4, %v2607_v46  ;;  %v1244_v15 = vmul.f32 %v1234_v4, %v2612_v47 }
 0xbb2   :  { %v1246_v21 = vmul.f32 %v1234_v4, %v2632_v54 }
 0xbb3   :  { %v1243_v16 = vmul.f32 %v1237_v7, %v2617_v48  ;;  %v2796_v17 = vpack.c.bf16 %v1237_v7, %v1234_v4  ;;  %v1241_v18 = vmul.f32 %v1237_v7, %v2622_v50  ;;  %v1245_v20 = vmul.f32 %v1237_v7, %v2627_v51 }
 0xbb4   :  { %v1247_v22 = vmul.f32 %v1237_v7, %v2637_v55 }
 0xbb5   :  { %1254 = vrot.lane.b32.xlu0 %v2796_v17, %s2396_s0  ;;  %v1248_v23 = vpack.c.bf16 %v1241_v18, %v1240_v14  ;;  %v1249_v25 = vpack.c.bf16 %v1243_v16, %v1242_v13  ;;  %v1250_v26 = vpack.c.bf16 %v1245_v20, %v1244_v15 }
 0xbb6   :  { %v1251_v27 = vpack.c.bf16 %v1247_v22, %v1246_v21 }
 0xbb7   :  { %2084 = vmatprep.mubr.msk.bf16.mxu0 %vm277_vm2, %v1248_v23 }
 0xc27   :  { %v1255_v47 = vpop.permute.xlu0 %1254 }
 0xc28   :  { %v1269_v28 = vsel %vm277_vm2, %v1255_v47, 0  ;;  %2143 = vmatprep.subr.msk.bf16.mxu0 %vm277_vm2, %v1255_v47 }
 0xc29   :  { %2083 = vmatpush3.bf16.xpose.msra.mxu0 %v1269_v28 }
 0xc2a   :  { %2102 = vmatprep.subr.bf16.mxu0 %v2393_v0 }
 0xc30   :  { %2085 = vmatmul.mubr.msk.bf16.vlgmr.msra.gmra.mrb[32].mxu0 %vm277_vm2, %v1249_v25 }
 0xc31   :  { %2088 = vmatprep.mubr.msk.bf16.mxu0 %vm277_vm2, %v1250_v26 }
 0xc38   :  { %2089 = vmatmul.mubr.msk.bf16.gmra.mrb[36].mxu0 %vm277_vm2, %v1251_v27 }
 0xc39   :  { %2110 = vmatprep.mubr.msk.bf16.mxu0 %vm2394_vm0, %v2393_v0 }
 0xc82   :  { %v2813_v51 = vpop.f32.mrb[28].mxu0 }
 0xc83   :  { %v2072_v31 = vpop.f32.mrb[29].mxu0 }
 0xc84   :  { %v2815_v32 = vpop.f32.mrb[30].mxu0 }
 0xc85   :  { %v2073_v60 = vpop.f32.mrb[31].mxu0 }
 0xd03   :  { %v2086_v30 = vpop.f32.mrb[32].mxu0 }
 0xd04   :  { %v1305_v29 = vpop.f32.mrb[33].mxu0  ;;  %v1342_v41 = vsel %vm134_vm1, %v2086_v30, -inf }
 0xd05   :  { %v2087_v35 = vpop.f32.mrb[34].mxu0  ;;  %v1336_v36 = vsel %vm134_vm1, %v1305_v29, -inf }
 0xd06   :  { %1337 = vmax.xlane.f32.xlu1 %v1336_v36  ;;  %v1308_v37 = vpop.f32.mrb[35].mxu0  ;;  %v1345_v39 = vsel %vm134_vm1, %v2087_v35, -inf }
 0xd07   :  { %v1339_v38 = vsel %vm134_vm1, %v1308_v37, -inf }
 0xd08   :  { %1340 = vmax.xlane.f32.xlu0 %v1339_v38 }
 0xd0a   :  { %1346 = vmax.xlane.f32.xlu1 %v1345_v39 }
 0xd0b   :  { %v2090_v40 = vpop.f32.mrb[36].mxu0 }
 0xd0c   :  { %1343 = vmax.xlane.f32.xlu0 %v1342_v41  ;;  %v1321_v42 = vpop.f32.mrb[37].mxu0  ;;  %v1354_v53 = vsel %vm134_vm1, %v2090_v40, -inf }
 0xd0d   :  { %v2091_v44 = vpop.f32.mrb[38].mxu0  ;;  %v1348_v49 = vsel %vm134_vm1, %v1321_v42, -inf }
 0xd0e   :  { %v1324_v45 = vpop.f32.mrb[39].mxu0  ;;  %v1357_v19 = vsel %vm134_vm1, %v2091_v44, -inf }
 0xd0f   :  { %v1351_v52 = vsel %vm134_vm1, %v1324_v45, -inf }
 0xd10   :  { %1349 = vmax.xlane.f32.xlu0 %v1348_v49  ;;  %1352 = vmax.xlane.f32.xlu1 %v1351_v52 }
 0xd14   :  { %1355 = vmax.xlane.f32.xlu0 %v1354_v53  ;;  %1358 = vmax.xlane.f32.xlu1 %v1357_v19 }
 0xd93   :  { %v1338_v58 = vpop.xlane.xlu1 %1337 }
 0xd94   :  { %v1360_v62 = vsub.f32 %v1305_v29, %v1338_v58 }
 0xd95   :  { %v1341_v59 = vpop.xlane.xlu0 %1340 }
 0xd96   :  { %v1361_v9 = vsub.f32 %v1308_v37, %v1341_v59  ;;  %v1368_v2 = vmul.f32 1.442695, %v1360_v62 }
 0xd97   :  { %v1347_v61 = vpop.xlane.xlu1 %1346 }
 0xd98   :  { %v1370_v8 = vmul.f32 1.442695, %v1361_v9  ;;  %v1363_v11 = vsub.f32 %v2087_v35, %v1347_v61 }
 0xd99   :  { %v1344_v12 = vpop.xlane.xlu0 %1343 }
 0xd9a   :  { %2210 = vpow2.f32 %v1370_v8  ;;  %v1374_v63 = vmul.f32 1.442695, %v1363_v11  ;;  %v1362_v1 = vsub.f32 %v2086_v30, %v1344_v12 }
 0xd9c   :  { %2212 = vpow2.f32 %v1374_v63  ;;  %v1372_v3 = vmul.f32 1.442695, %v1362_v1 }
 0xd9d   :  { %v1350_v4 = vpop.xlane.xlu0 %1349  ;;  %v1353_v5 = vpop.xlane.xlu1 %1352 }
 0xd9e   :  { %2214 = vpow2.f32 %v1372_v3  ;;  %v1365_v6 = vsub.f32 %v1324_v45, %v1353_v5  ;;  %v1364_v7 = vsub.f32 %v1321_v42, %v1350_v4 }
 0xd9f   :  { %2216 = vpow2.f32 %v1368_v2 }
 0xda0   :  { %v1378_v10 = vmul.f32 1.442695, %v1365_v6  ;;  %v1376_v20 = vmul.f32 1.442695, %v1364_v7 }
 0xda1   :  { %v1356_v13 = vpop.xlane.xlu0 %1355  ;;  %v1359_v14 = vpop.xlane.xlu1 %1358 }
 0xda2   :  { %v1366_v15 = vsub.f32 %v2090_v40, %v1356_v13  ;;  %v1367_v16 = vsub.f32 %v2091_v44, %v1359_v14  ;;  %2218 = vpow2.f32 %v1378_v10 }
 0xda4   :  { %v2211_v18 = vpop.eup %2210  ;;  %v1380_v21 = vmul.f32 1.442695, %v1366_v15  ;;  %v1382_v22 = vmul.f32 1.442695, %v1367_v16 }
 0xda5   :  { %v1387_v23 = vsel %vm134_vm1, %v2211_v18, 0.0 }
 0xda6   :  { %v2213_v25 = vpop.eup %2212  ;;  %2220 = vpow2.f32 %v1380_v21  ;;  %1388 = vadd.xlane.f32.xlu1 %v1387_v23 }
 0xda7   :  { %2222 = vpow2.f32 %v1382_v22  ;;  %v1393_v47 = vsel %vm134_vm1, %v2213_v25, 0.0 }
 0xda8   :  { %v2215_v26 = vpop.eup %2214  ;;  %2224 = vpow2.f32 %v1376_v20 }
 0xda9   :  { %v1390_v27 = vsel %vm134_vm1, %v2215_v26, 0.0  ;;  %v2217_v28 = vpop.eup %2216 }
 0xdaa   :  { %1391 = vadd.xlane.f32.xlu0 %v1390_v27  ;;  %1394 = vadd.xlane.f32.xlu1 %v1393_v47  ;;  %v1384_v60 = vsel %vm134_vm1, %v2217_v28, 0.0 }
 0xdac   :  { %v2219_v31 = vpop.eup %2218 }
 0xdad   :  { %v1399_v30 = vsel %vm134_vm1, %v2219_v31, 0.0 }
 0xdae   :  { %1385 = vadd.xlane.f32.xlu0 %v1384_v60  ;;  %1400 = vadd.xlane.f32.xlu1 %v1399_v30 }
 0xdb0   :  { %v2221_v29 = vpop.eup %2220 }
 0xdb1   :  { %v2223_v35 = vpop.eup %2222  ;;  %v1402_v36 = vsel %vm134_vm1, %v2221_v29, 0.0 }
 0xdb2   :  { %v2225_v37 = vpop.eup %2224  ;;  %1403 = vadd.xlane.f32.xlu0 %v1402_v36  ;;  %v1405_v38 = vsel %vm134_vm1, %v2223_v35, 0.0 }
 0xdb3   :  { %1406 = vadd.xlane.f32.xlu1 %v1405_v38  ;;  %v1396_v39 = vsel %vm134_vm1, %v2225_v37, 0.0 }
 0xdb6   :  { %1397 = vadd.xlane.f32.xlu0 %v1396_v39 }
 0xdc4   :  { %1567 = vrot.lane.b32.xlu1 %v2784_v56, %s2396_s0 }
 0xdc8   :  { %1569 = vrot.lane.b32.xlu1 %v2788_v57, %s2396_s0 }
 0xdcc   :  { %1428 = vrot.lane.b32.xlu0 %v2796_v17, %s2386_s21  ;;  %1643 = vrot.lane.b32.xlu1 %v2788_v57, %s2386_s21 }
 0xdd0   :  { %1641 = vrot.lane.b32.xlu0 %v2784_v56, %s2386_s21 }
 0xe33   :  { %v1389_v40 = vpop.xlane.xlu1 %1388 }
 0xe37   :  { %v1392_v41 = vpop.xlane.xlu0 %1391  ;;  %v1395_v42 = vpop.xlane.xlu1 %1394 }
 0xe38   :  { %2226 = vrcp.f32 %v1392_v41  ;;  %v2174_v41 = vld [vmem:[#allocation8 + $0x20] sm:$0xff]  }
 0xe39   :  { %2228 = vrcp.f32 %v1395_v42  ;;  %v2175_v42 = vld [vmem:[#allocation8 + $0x28] sm:$0xff]  }
 0xe3a   :  { %2230 = vrcp.f32 %v1389_v40 }
 0xe3b   :  { %v1386_v44 = vpop.xlane.xlu0 %1385  ;;  %v1401_v45 = vpop.xlane.xlu1 %1400 }
 0xe3c   :  { %2232 = vrcp.f32 %v1386_v44  ;;  %v1851_v44 = vld [vmem:[#allocation10 + $0x10] ss:$0 sm:$0xff] }
 0xe3f   :  { %v1404_v49 = vpop.xlane.xlu0 %1403 }
 0xe40   :  { %2234 = vrcp.f32 %v1404_v49  ;;  %v1407_v52 = vpop.xlane.xlu1 %1406 }
 0xe41   :  { %2236 = vrcp.f32 %v1407_v52  ;;  %v1868_v52 = vld [vmem:[#allocation10 + $0x28] ss:$0 sm:$0xff] }
 0xe42   :  { %v2227_v17 = vpop.eup %2226  ;;  %2238 = vrcp.f32 %v1401_v45  ;;  %v1866_v45 = vld [vmem:[#allocation10 + $0x20] ss:$0 sm:$0xff] }
 0xe43   :  { %v2229_v53 = vpop.eup %2228  ;;  %v1398_v57 = vpop.xlane.xlu0 %1397  ;;  %v1418_v58 = vmul.f32 %v2227_v17, %v2215_v26  ;;  %v1183_v17 = vadd.f32 %v1851_v44, %v2813_v51  ;;  %v2176_v51 = vld [vmem:[#allocation8 + $0x30] sm:$0xff]  }
 0xe44   :  { %v2231_v19 = vpop.eup %2230  ;;  %2240 = vrcp.f32 %v1398_v57  ;;  %v1419_v59 = vmul.f32 %v2229_v53, %v2213_v25  ;;  %v1568_v13 = vpop.permute.xlu1 %1567 }
 0xe45   :  { %v1417_v62 = vmul.f32 %v2231_v19, %v2211_v18 }
 0xe46   :  { %v2233_v56 = vpop.eup %2232  ;;  %v1425_v12 = vpack.c.bf16 %v1419_v59, %v1418_v58  ;;  %v1624_v59 = vmul.f32 %v1868_v52, %v2762_v33  ;;  %v1870_v33 = vld [vmem:[#allocation10 + $0x38] ss:$0 sm:$0xff] }
 0xe47   :  { %v1429_v9 = vpop.permute.xlu0 %1428  ;;  %v1416_v61 = vmul.f32 %v2233_v56, %v2217_v28  ;;  %v1186_v56 = vadd.f32 %v1851_v44, %v2815_v32  ;;  %v2177_v32 = vld [vmem:[#allocation8 + $0x38] sm:$0xff]  }
 0xe48   :  { %2092 = vmatprep.subr.bf16.mxu1 %v1429_v9 }
 0xe49   :  { %2093 = vmatpush3.bf16.msra.mxu1 %v1429_v9  ;;  %v1424_v8 = vpack.c.bf16 %v1417_v62, %v1416_v61 }
 0xe4a   :  { %v2235_v11 = vpop.eup %2234  ;;  %2114 = vmatprep.subr.bf16.mxu1 %v2393_v0 }
 0xe4b   :  { %v2237_v63 = vpop.eup %2236  ;;  %2094 = vmatprep.mubr.msk.bf16.mxu1 %vm134_vm1, %v1424_v8  ;;  %v1422_v3 = vmul.f32 %v2235_v11, %v2221_v29  ;;  %v1642_v40 = vpop.permute.xlu0 %1641  ;;  %v1625_v11 = vmul.f32 %v1868_v52, %v2764_v34 }
 0xe4c   :  { %v2239_v1 = vpop.eup %2238  ;;  %2095 = vmatmul.mubr.msk.bf16.vlgmr.msra.gmra.mrb[36].mxu1 %vm134_vm1, %v1425_v12  ;;  %v1423_v4 = vmul.f32 %v2237_v63, %v2223_v35  ;;  %v1869_v12 = vld [vmem:[#allocation10 + $0x30] ss:$0 sm:$0xff] }
 0xe4d   :  { %v1421_v6 = vmul.f32 %v2239_v1, %v2219_v31  ;;  %2115 = vmatpush3.bf16.msra.mxu1 %v1568_v13 }
 0xe4e   :  { %v2241_v2 = vpop.eup %2240  ;;  %v1427_v10 = vpack.c.bf16 %v1423_v4, %v1422_v3  ;;  %2116 = vmatprep.subr.bf16.mxu1 %v2393_v0 }
 0xe4f   :  { %v1420_v5 = vmul.f32 %v2241_v2, %v2225_v37 }
 0xe51   :  { %v1426_v7 = vpack.c.bf16 %v1421_v6, %v1420_v5 }
 0xe53   :  { %2098 = vmatprep.mubr.msk.bf16.mxu1 %vm134_vm1, %v1426_v7 }
 0xe54   :  { %2099 = vmatmul.mubr.msk.bf16.gmra.mrb[40].mxu1 %vm134_vm1, %v1427_v10 }
 0xe55   :  { %2118 = vmatprep.mubr.msk.bf16.mxu1 %vm2394_vm0, %v2393_v0 }
 0xf1f   :  { %v2096_v14 = vpop.f32.mrb[36].mxu1 }
 0xf20   :  { %v1477_v15 = vpop.f32.mrb[37].mxu1  ;;  %v1510_v18 = vmul.f32 %v2096_v14, %v2601_v43 }
 0xf21   :  { %v2097_v16 = vpop.f32.mrb[38].mxu1  ;;  %v1508_v22 = vmul.f32 %v1477_v15, %v2607_v46 }
 0xf22   :  { %v1511_v20 = vmul.f32 %v2097_v16, %v2617_v48  ;;  %v1480_v21 = vpop.f32.mrb[39].mxu1  ;;  %v2242_v48 = vld [vmem:[%s2905_s3 + $0x20] sm:$0xff]  ;;  %v1872_v16 = vld [vmem:[#allocation10 + $0x40] ss:$0 sm:$0xff] }
 0xf23   :  { %v1509_v23 = vmul.f32 %v1480_v21, %v2622_v50  ;;  %v2243_v50 = vld [vmem:[%s2905_s3 + $0x28] sm:$0xff]  ;;  %s2397_s3 = smov [#allocation11]  }
 0xf24   :  { %v1517_v25 = vpack.c.bf16 %v1511_v20, %v1510_v18  ;;  %v1878_v18 = vld [vmem:[#allocation10 + $0x48] ss:$0 sm:$0xff]  ;;  %s1790_s17 = sshll.u32 %s2397_s3, 4  ;;  %s1791_s17 = int_to_ptr.vmem [resolvable:$true] %s1790_s17 }
 0xf25   :  { %v1516_v26 = vpack.c.bf16 %v1509_v23, %v1508_v22  ;;  %v1879_v23 = vld [vmem:[#allocation10 + $0x50] ss:$0 sm:$0xff]  ;;  %s2354_s27 = scalar_lea.vmem %s1791_s17, 256  ;;  %p2359_p13 = scmp.lt.s32.totalorder %s1791_s17, %s1791_s17 }
 0xf26   :  { %p2355_p12 = scmp.ne.s32.totalorder %s1791_s17, %s2354_s27  ;;  %p2360_p0 = scmp.lt.s32.totalorder %s2354_s27, %s2354_s27 }
 0xf27   :  { %v2100_v27 = vpop.f32.mrb[40].mxu1  ;;  %2103 = vmatpush3.bf16.msra.mxu0 %v1516_v26 }
 0xf28   :  { %v1493_v47 = vpop.f32.mrb[41].mxu1  ;;  %2104 = vmatprep.subr.bf16.mxu0 %v2393_v0  ;;  %v1514_v31 = vmul.f32 %v2100_v27, %v2632_v54  ;;  %v1570_v54 = vpop.permute.xlu1 %1569  ;;  %p2361_p1 = por %p2360_p0, %p2359_p13 }
 0xf29   :  { %v2101_v28 = vpop.f32.mrb[42].mxu1  ;;  %v1512_v46 = vmul.f32 %v2242_v48, %v1493_v47  ;;  %2117 = vmatpush3.bf16.msra.mxu1 %v1570_v54 }
 0xf2a   :  { %v1515_v60 = vmul.f32 %v2101_v28, %v2637_v55  ;;  %v1496_v43 = vpop.f32.mrb[43].mxu1  ;;  %2130 = vmatprep.subr.bf16.mxu1 %v2393_v0  ;;  %p2362_p2 = pnand %p2361_p1, %p2355_p12 }
 0xf2b   :  { %v1513_v30 = vmul.f32 %v2243_v50, %v1496_v43  ;;  %2105 = vmatpush3.bf16.msra.mxu0 %v1517_v25 }
 0xf2c   :  { %v1519_v29 = vpack.c.bf16 %v1515_v60, %v1514_v31  ;;  %2106 = vmatprep.subr.bf16.mxu0 %v2393_v0 }
 0xf2d   :  { %v1518_v35 = vpack.c.bf16 %v1513_v30, %v1512_v46 }
 0xf2f   :  { %2107 = vmatpush3.bf16.msra.mxu0 %v1518_v35 }
 0xf30   :  { %2108 = vmatprep.subr.bf16.mxu0 %v2393_v0 }
 0xf33   :  { %2109 = vmatpush3.bf16.msra.mxu0 %v1519_v29 }
 0xf34   :  { %2122 = vmatprep.subr.bf16.mxu0 %v2393_v0 }
 0xf36   :  { %2111 = vmatmul.mubr.msk.bf16.vlgmr.msra.gmra.mrb[40].mxu0 %vm722_vm3, %v2709_v24  ;;  %v1644_v24 = vpop.permute.xlu1 %1643 }
 0xf37   :  { %2126 = vmatprep.mubr.msk.bf16.mxu0 %vm2394_vm0, %v2393_v0  ;;  %2123 = vmatpush3.bf16.msra.mxu0 %v1642_v40 }
 0xf38   :  { %2124 = vmatprep.subr.bf16.mxu0 %v2393_v0 }
 0xf3b   :  { %2125 = vmatpush3.bf16.msra.mxu0 %v1644_v24 }
0x1009   :  { %v1554_v55 = vpop.f32.mrb[40].mxu0 }
0x100a   :  { %v2112_v36 = vpop.f32.mrb[41].mxu0 }
0x100b   :  { %v1557_v37 = vpop.f32.mrb[42].mxu0 }
0x100c   :  { %v1561_v38 = vpack.c.bf16 %v1557_v37, %v1554_v55  ;;  %v2113_v39 = vpop.f32.mrb[43].mxu0 }
0x100e   :  { %2119 = vmatmul.mubr.msk.bf16.vlgmr.msra.gmra.mrb[44].mxu1 %vm277_vm2, %v1561_v38 }
0x100f   :  { %2138 = vmatprep.mubr.msk.bf16.mxu1 %vm2394_vm0, %v2393_v0  ;;  %2131 = vmatpush3.bf16.msra.mxu1 %v2174_v41 }
0x1010   :  { %2132 = vmatprep.subr.bf16.mxu1 %v2393_v0 }
0x1013   :  { %2133 = vmatpush3.bf16.msra.mxu1 %v2175_v42 }
0x1014   :  { %2134 = vmatprep.subr.bf16.mxu1 %v2393_v0 }
0x1017   :  { %2135 = vmatpush3.bf16.msra.mxu1 %v2176_v51 }
0x1018   :  { %2136 = vmatprep.subr.bf16.mxu1 %v2393_v0 }
0x101b   :  { %2137 = vmatpush3.bf16.msra.mxu1 %v2177_v32 }
0x10e1   :  { %v1610_v49 = vpop.f32.mrb[44].mxu1 }
0x10e2   :  { %v1611_v53 = vadd.f32 %v1866_v45, %v1610_v49  ;;  %v2120_v57 = vpop.f32.mrb[45].mxu1 }
0x10e3   :  { %v1613_v19 = vpop.f32.mrb[46].mxu1 }
0x10e4   :  { %v1617_v58 = vadd.f32 %v1611_v53, %v1183_v17  ;;  %v1614_v9 = vadd.f32 %v1866_v45, %v1613_v19  ;;  %v2121_v61 = vpop.f32.mrb[47].mxu1 }
0x10e6   :  { %v1626_v62 = vadd.f32 %v1624_v59, %v1617_v58  ;;  %v1618_v8 = vadd.f32 %v1614_v9, %v1186_v56 }
0x10e8   :  { %v1627_v63 = vadd.f32 %v1625_v11, %v1618_v8  ;;  %v1633_v1 = vadd.f32 %v1869_v12, %v1626_v62 }
0x10ea   :  { %v1634_v2 = vadd.f32 %v1869_v12, %v1627_v63  ;;  %v1772_v22 = vmul.f32 %v1878_v18, %v1633_v1 }
0x10ec   :  { %v1635_v3 = vpack.c.bf16 %v1634_v2, %v1633_v1  ;;  %v1773_v47 = vmul.f32 %v1878_v18, %v1634_v2 }
0x10ee   :  { %2127 = vmatmul.mubr.msk.bf16.vlgmr.msra.gmra.mrb[44].mxu0 %vm277_vm2, %v1635_v3 }
0x11c1   :  { %v1684_v4 = vpop.f32.mrb[44].mxu0 }
0x11c2   :  { %v1685_v5 = vadd.f32 %v1870_v33, %v1684_v4  ;;  %v2128_v6 = vpop.f32.mrb[45].mxu0 }
0x11c3   :  { %v1687_v7 = vpop.f32.mrb[46].mxu0 }
0x11c4   :  { %v1688_v10 = vadd.f32 %v1870_v33, %v1687_v7  ;;  %v2129_v34 = vpop.f32.mrb[47].mxu0  ;;  %v1691_v13 = vmax.f32 %v1685_v5, 0.0 }
0x11c6   :  { %v1692_v14 = vmax.f32 %v1688_v10, 0.0 }
0x11c8   :  { %v1693_v15 = vpack.c.bf16 %v1692_v14, %v1691_v13 }
0x11ca   :  { %2139 = vmatmul.mubr.msk.bf16.vlgmr.msra.gmra.mrb[48].mxu1 %vm722_vm3, %v1693_v15 }
0x129d   :  { %v1760_v20 = vpop.f32.mrb[48].mxu1 }
0x129e   :  { %v1761_v21 = vadd.f32 %v1872_v16, %v1760_v20  ;;  %v2140_v0 = vpop.f32.mrb[49].mxu1 }
0x129f   :  { %v1763_v25 = vpop.f32.mrb[50].mxu1 }
0x12a0   :  { %v1774_v26 = vadd.f32 %v1772_v22, %v1761_v21  ;;  %v1764_v27 = vadd.f32 %v1872_v16, %v1763_v25  ;;  %v2141_v28 = vpop.f32.mrb[51].mxu1 }
0x12a2   :  { %v1781_v31 = vadd.f32 %v1879_v23, %v1774_v26  ;;  %v1775_v60 = vadd.f32 %v1773_v47, %v1764_v27 }
0x12a4   :  { %1783 = vst.msk [vmem:[#allocation11] sm:$0xff] %vm277_vm2, %v1781_v31  ;;  %v1782_v43 = vadd.f32 %v1879_v23, %v1775_v60 }
0x12a6   :  { %1784 = vst.msk [vmem:[#allocation11 + $0x8] sm:$0xff] %vm277_vm2, %v1782_v43 }
0x12a7   :  { %2365 = shalt.err (!%p2362_p2)
}
0x12a8   :  { %s2366_s30 = scalar_lea.hbm %s2911_s9, 256 }
0x12a9   :  { %p2367_p3 = scmp.ne.s32.totalorder %s2911_s9, %s2366_s30  ;;  %p2370_p4 = scmp.lt.u32.totalorder %s2366_s30, %s2911_s9 }
0x12ab   :  { %p2372_p5 = pnand %p2370_p4, %p2367_p3 }
0x12ad   :  { %2375 = shalt.err (!%p2372_p5)
}
0x12ae   :  { %1796 = dma.vmem_to_hbm [thread:$0]  %s1791_s17, 256, %s2911_s9, [#allocation4], %s2391_s5, %s2391_s5, %s2392_s22  }
0x12af   :  { %2382 = dma.done.wait [#allocation4], 256  }
0x12b0   :  { %2383 = vsyncadd [#allocation4], 4294967040 }
0x12b1   :  { %1800 = vsyncpa [#allocation3], 1 }
0x12b2   :  { %1801 = vsyncpa [#allocation6], 1 }
0x12b3   :  { %1802 = vsyncpa [#allocation9], 1 }
0x12b4   :  { %1803 = vsyncpa [#allocation4], 1 }

</bundles_post_ra>
